<compile_context>
chip_gen: v5e
topology: v5e:2x2
jax: 0.10.0
libtpu: 0.0.40
codegen_flags: <defaults>
</compile_context>

<pallas_src>
import math

import jax
import jax.numpy as jnp
from jax.experimental import pallas as pl
from jax.experimental.pallas import tpu as pltpu

EPS = 1e-5                    # torch BatchNorm1d default eps
K_DUAL = 7                    # kernel size of the dual convs
HALO = 6                      # max reach: (7 // 2) * dilation 2
K_MIX = 3

# Shifts actually used by the fused (dil=1, dil=2) conv pair: dil=1 covers
# -3..3, dil=2 covers even shifts -6..6; +/-5 never occur -> 11 windows.
SHIFTS_DUAL = (-6, -4, -3, -2, -1, 0, 1, 2, 3, 4, 6)
NWIN = len(SHIFTS_DUAL)
SHIFTS_MIX = (-1, 0, 1)       # k=3, zero padding

# MXU operand dtype. jnp.bfloat16 gives ~2-4x matmul throughput on v6e/v7x but
# needs the tolerance relaxed to ~2e-2; f32 keeps the strict 1e-4 check.
MXU_DTYPE = jnp.float32


# ---------------------------------------------------------------------------
# in-kernel helpers: shifted windows on the lane-packed (C, N*L) layout
# ---------------------------------------------------------------------------
def _shift_masks(lane_l, seq_len):
    """lane_l: (1, N*L) iota % L.  mask[s] selects flat positions whose
    within-batch source index l + s stays inside [0, L)."""
    masks = {}
    for s in set(SHIFTS_DUAL) | set(SHIFTS_MIX):
        if s > 0:
            masks[s] = lane_l < (seq_len - s)
        elif s < 0:
            masks[s] = lane_l >= (-s)
    return masks


def _circ_cols(h2, masks, seq_len, shifts):
    """h2: (C, N*L).  Returns (len(shifts)*C, N*L); block for shift s holds
    h2[c, n*L + (l + s) % L] (per-batch circular shift) at flat pos n*L + l."""
    nl = h2.shape[1]
    outs = []
    for s in shifts:
        if s == 0:
            outs.append(h2)
            continue
        near = pltpu.roll(h2, (-s) % nl, axis=1)       # value at p + s (in-batch)
        wrap = (seq_len - s) if s > 0 else (-s - seq_len)
        far = pltpu.roll(h2, wrap % nl, axis=1)        # wrapped value (circular)
        outs.append(jnp.where(masks[s], near, far))
    return jnp.concatenate(outs, axis=0)


def _zero_cols(h2, masks, shifts):
    """Same as _circ_cols but with per-batch ZERO padding (mix conv)."""
    nl = h2.shape[1]
    outs = []
    for s in shifts:
        if s == 0:
            outs.append(h2)
            continue
        near = pltpu.roll(h2, (-s) % nl, axis=1)
        outs.append(jnp.where(masks[s], near, 0.0))
    return jnp.concatenate(outs, axis=0)


# ---------------------------------------------------------------------------
# fused kernel: 4 x (dual conv + ReLU + concat + BN) -> mix conv -> concat(x)
# ---------------------------------------------------------------------------
def _make_kernel(seq_len):
    def kernel(x_ref, *refs):
        # refs = 4 stages x (W_packed, bias, gamma, beta) + (W_mix, b_mix) + out
        stage_refs = [refs[4 * s: 4 * s + 4] for s in range(4)]
        wm_ref, bm_ref, out_ref = refs[16], refs[17], refs[18]

        nl = x_ref.shape[1]
        lane_l = jax.lax.broadcasted_iota(jnp.int32, (1, nl), 1) % seq_len
        masks = _shift_masks(lane_l, seq_len)            # computed once, reused

        h = x_ref[...]                                   # (Cin0, N*L)
        for w_ref, b_ref, g_ref, be_ref in stage_refs:
            # dual circular conv (dil 1 & 2) + bias + ReLU as ONE matmul whose
            # output rows are already the channel-concat [conv_s_1 ; conv_s_2]
            cols = _circ_cols(h, masks, seq_len, SHIFTS_DUAL)   # (NWIN*Cin, N*L)
            y = jnp.dot(w_ref[...].astype(MXU_DTYPE), cols.astype(MXU_DTYPE),
                        preferred_element_type=jnp.float32)
            y = jnp.maximum(y + b_ref[...], 0.0)                # (C2, N*L)
            # training-mode BatchNorm over the whole batch (all N*L lanes), f32
            mean = jnp.mean(y, axis=1, keepdims=True)
            var = jnp.mean(jnp.square(y - mean), axis=1, keepdims=True)
            scale = g_ref[...] * jax.lax.rsqrt(var + EPS)
            h = (y - mean) * scale + be_ref[...]

        # mix conv (k=3, zero padding) + concat with the block input
        cols = _zero_cols(h, masks, SHIFTS_MIX)                 # (3*Cmix, N*L)
        m = jnp.dot(wm_ref[...].astype(MXU_DTYPE), cols.astype(MXU_DTYPE),
                    preferred_element_type=jnp.float32) + bm_ref[...]
        ch = wm_ref.shape[0]
        cin0 = x_ref.shape[0]
        out_ref[0:ch, :] = m                          # lane-dense store
        out_ref[ch:ch + cin0, :] = x_ref[...]         # bulk residual copy

    return kernel


# ---------------------------------------------------------------------------
# host-side weight packing (fuse dil=1 / dil=2 convs into one im2col weight)
# ---------------------------------------------------------------------------
def _pack_dual(wa, wb):
    """wa, wb: torch layout (Cout, Cin, 7) -> (2*Cout, NWIN*Cin).
    Column block i multiplies the window shifted by SHIFTS_DUAL[i]."""
    ca, cin, k = wa.shape
    assert k == K_DUAL and wb.shape == wa.shape
    half = K_DUAL // 2
    pos = {s: i for i, s in enumerate(SHIFTS_DUAL)}
    wp = jnp.zeros((2 * ca, NWIN * cin), jnp.float32)
    for kk in range(K_DUAL):
        j1 = pos[(kk - half) * 1]          # dilation-1 tap -> shift kk-3
        j2 = pos[(kk - half) * 2]          # dilation-2 tap -> shift 2*(kk-3)
        wp = wp.at[:ca, j1 * cin:(j1 + 1) * cin].set(wa[:, :, kk])
        wp = wp.at[ca:, j2 * cin:(j2 + 1) * cin].set(wb[:, :, kk])
    return wp


def _pack_mix(wm):
    """(ch, Cin, 3) -> (ch, 3*Cin); block j == shift SHIFTS_MIX[j] == tap j."""
    ch_, cin, k = wm.shape
    assert k == K_MIX
    return jnp.transpose(wm, (0, 2, 1)).reshape(ch_, k * cin)


def pack_params(params):
    packed = {}
    for s in range(1, 5):
        wa, ba = params[f"conv{s}_1"]
        wb, bb = params[f"conv{s}_2"]
        g, be = params[f"bn{s}"]
        packed[f"w{s}"] = _pack_dual(wa, wb)
        packed[f"b{s}"] = jnp.concatenate([ba, bb]).reshape(-1, 1)
        packed[f"g{s}"] = g.reshape(-1, 1)
        packed[f"beta{s}"] = be.reshape(-1, 1)
    wm, bm = params["mix"]
    packed["wm"] = _pack_mix(wm)
    packed["bm"] = bm.reshape(-1, 1)
    return packed


# ---------------------------------------------------------------------------
# forward wrapper (matches Starter_Block.forward, training-mode BatchNorm)
# ---------------------------------------------------------------------------
@jax.jit
def starter_block_forward(x, packed):
    """x: (N, 2, L) float32 -> (N, ch + 2, L)."""
    n, cin0, l = x.shape
    assert l > HALO, "sequence length must exceed the dilated-conv halo (6)"
    ch = packed["wm"].shape[0]
    nl = n * l

    # lane-pack: (N, C, L) -> (C, N*L) so the kernel's last dim is dense lanes
    x2 = jnp.transpose(x, (1, 0, 2)).reshape(cin0, nl)

    args = [x2]
    for s in range(1, 5):
        args += [packed[f"w{s}"], packed[f"b{s}"],
                 packed[f"g{s}"], packed[f"beta{s}"]]
    args += [packed["wm"], packed["bm"]]

    flops = 2 * nl * sum(int(packed[f"w{s}"].shape[0]) * int(packed[f"w{s}"].shape[1])
                         for s in range(1, 5))
    flops += 2 * nl * int(ch) * int(packed["wm"].shape[1])
    transcendentals = sum(int(packed[f"g{s}"].size) for s in range(1, 5))
    bytes_accessed = 4 * (sum(int(a.size) for a in args) + (ch + cin0) * nl)

    vmem = pl.BlockSpec(memory_space=pltpu.MemorySpace.VMEM)
    out2 = pl.pallas_call(
        _make_kernel(l),
        out_shape=jax.ShapeDtypeStruct((ch + cin0, nl), jnp.float32),
        in_specs=[vmem] * len(args),
        out_specs=vmem,
        compiler_params=pltpu.CompilerParams(vmem_limit_bytes=32 * 1024 * 1024),
        cost_estimate=pl.CostEstimate(flops=flops,
                                      transcendentals=transcendentals,
                                      bytes_accessed=bytes_accessed),
    )(*args)

    # back to the module's (N, ch + Cin0, L) layout (tiny XLA reshape/transpose)
    return jnp.transpose(out2.reshape(ch + cin0, n, l), (1, 0, 2))


# ---------------------------------------------------------------------------
# parameter init (torch-layout weights) + pure-JAX reference
# ---------------------------------------------------------------------------
def _init_conv(key, cout, cin, k):
    bound = 1.0 / math.sqrt(cin * k)
    kw, kb = jax.random.split(key)
    w = jax.random.uniform(kw, (cout, cin, k), jnp.float32, -bound, bound)
    b = jax.random.uniform(kb, (cout,), jnp.float32, -bound, bound)
    return w, b


def make_params(factor, ch, key):
    c1 = math.floor(9 * factor)
    c2 = math.floor(10 * factor)
    keys = jax.random.split(key, 14)
    p = {}
    p["conv1_1"] = _init_conv(keys[0], c1, 2, 7)
    p["conv1_2"] = _init_conv(keys[1], c1, 2, 7)
    p["conv2_1"] = _init_conv(keys[2], c2, 2 * c1, 7)
    p["conv2_2"] = _init_conv(keys[3], c2, 2 * c1, 7)
    p["conv3_1"] = _init_conv(keys[4], c2, 2 * c2, 7)
    p["conv3_2"] = _init_conv(keys[5], c2, 2 * c2, 7)
    p["conv4_1"] = _init_conv(keys[6], c2, 2 * c2, 7)
    p["conv4_2"] = _init_conv(keys[7], c2, 2 * c2, 7)
    p["mix"] = _init_conv(keys[8], ch, 2 * c2, 3)
    bn_ch = [2 * c1, 2 * c2, 2 * c2, 2 * c2]
    for i, c in enumerate(bn_ch, start=1):
        kg, kb = jax.random.split(keys[8 + i])
        p[f"bn{i}"] = (jax.random.uniform(kg, (c,), jnp.float32, 0.5, 1.5),
                       jax.random.uniform(kb, (c,), jnp.float32, -0.5, 0.5))
    return p


def _conv1d_ref(x, w, b, pad, dil, circular):
    mode = "wrap" if circular else "constant"
    xp = jnp.pad(x, ((0, 0), (0, 0), (pad, pad)), mode=mode)
    out = jax.lax.conv_general_dilated(
        xp, w, window_strides=(1,), padding="VALID", rhs_dilation=(dil,),
        dimension_numbers=("NCH", "OIH", "NCH"))
    return out + b[None, :, None]


def _bn_ref(x, g, bt):
    mean = jnp.mean(x, axis=(0, 2), keepdims=True)
    var = jnp.mean((x - mean) ** 2, axis=(0, 2), keepdims=True)
    return (x - mean) * jax.lax.rsqrt(var + EPS) * g[None, :, None] \
        + bt[None, :, None]


def starter_block_ref(x, params):
    h = x
    for s in range(1, 5):
        wa, ba = params[f"conv{s}_1"]
        wb, bb = params[f"conv{s}_2"]
        g, bt = params[f"bn{s}"]
        a = jnp.maximum(_conv1d_ref(h, wa, ba, 3, 1, True), 0.0)
        b = jnp.maximum(_conv1d_ref(h, wb, bb, 6, 2, True), 0.0)
        h = _bn_ref(jnp.concatenate([a, b], axis=1), g, bt)
    wm, bm = params["mix"]
    m = _conv1d_ref(h, wm, bm, 1, 1, False)
    return jnp.concatenate([m, x], axis=1)


# ---------------------------------------------------------------------------
if __name__ == "__main__":
    factor, ch = 1, 4
    N, L = 2, 64            # N*L = 128 -> lane-dense activations & stores
    key = jax.random.PRNGKey(0)
    kx, kp = jax.random.split(key)

    x = jax.random.normal(kx, (N, 2, L), jnp.float32)       # (N, C=2, L)
    params = make_params(factor, ch, kp)
    packed = pack_params(params)

    out = jax.block_until_ready(starter_block_forward(x, packed))
    ref = starter_block_ref(x, params)

    assert out.shape == (N, ch + 2, L), out.shape
    assert bool(jnp.all(jnp.isfinite(out)))
    err = float(jnp.max(jnp.abs(out - ref)))
    assert jnp.allclose(out, ref, atol=1e-4, rtol=1e-4), err
    print("KERNEL_OK")
</pallas_src>

<mosaic_0001>
module attributes {stable_mosaic.version = 11 : i64} {
  func.func @kernel(%arg0: memref<2x128xf32, #tpu.memory_space<vmem>>, %arg1: memref<18x22xf32, #tpu.memory_space<vmem>>, %arg2: memref<18x1xf32, #tpu.memory_space<vmem>>, %arg3: memref<18x1xf32, #tpu.memory_space<vmem>>, %arg4: memref<18x1xf32, #tpu.memory_space<vmem>>, %arg5: memref<20x198xf32, #tpu.memory_space<vmem>>, %arg6: memref<20x1xf32, #tpu.memory_space<vmem>>, %arg7: memref<20x1xf32, #tpu.memory_space<vmem>>, %arg8: memref<20x1xf32, #tpu.memory_space<vmem>>, %arg9: memref<20x220xf32, #tpu.memory_space<vmem>>, %arg10: memref<20x1xf32, #tpu.memory_space<vmem>>, %arg11: memref<20x1xf32, #tpu.memory_space<vmem>>, %arg12: memref<20x1xf32, #tpu.memory_space<vmem>>, %arg13: memref<20x220xf32, #tpu.memory_space<vmem>>, %arg14: memref<20x1xf32, #tpu.memory_space<vmem>>, %arg15: memref<20x1xf32, #tpu.memory_space<vmem>>, %arg16: memref<20x1xf32, #tpu.memory_space<vmem>>, %arg17: memref<4x60xf32, #tpu.memory_space<vmem>>, %arg18: memref<4x1xf32, #tpu.memory_space<vmem>>, %arg19: memref<6x128xf32, #tpu.memory_space<vmem>>) attributes {dimension_semantics = [], scalar_prefetch = 0 : i64, scratch_operands = 0 : i64, tpu.core_type = #tpu.core_type<tc>} {
    %0 = tpu.iota {dimensions = array<i32: 1>} : vector<1x128xi32>
    %c64_i32 = arith.constant 64 : i32
    %c0_i32 = arith.constant 0 : i32
    %1 = arith.cmpi eq, %c64_i32, %c0_i32 : i32
    %c1_i32 = arith.constant 1 : i32
    %2 = arith.select %1, %c1_i32, %c64_i32 : i32
    %3 = vector.broadcast %2 : i32 to vector<1x128xi32>
    %4 = arith.remsi %0, %3 : vector<1x128xi32>
    %c0_i32_0 = arith.constant 0 : i32
    %5 = vector.broadcast %c0_i32_0 : i32 to vector<1x128xi32>
    %6 = arith.cmpi ne, %4, %5 : vector<1x128xi32>
    %c0_i32_1 = arith.constant 0 : i32
    %7 = vector.broadcast %c0_i32_1 : i32 to vector<1x128xi32>
    %8 = arith.cmpi slt, %4, %7 : vector<1x128xi32>
    %c0_i32_2 = arith.constant 0 : i32
    %9 = arith.cmpi slt, %2, %c0_i32_2 : i32
    %10 = vector.broadcast %9 : i1 to vector<1x128xi1>
    %11 = vector.broadcast %10 : vector<1x128xi1> to vector<1x128xi1>
    %12 = arith.xori %8, %11 : vector<1x128xi1>
    %13 = arith.andi %12, %6 : vector<1x128xi1>
    %14 = vector.broadcast %2 : i32 to vector<1x128xi32>
    %15 = arith.addi %4, %14 : vector<1x128xi32>
    %16 = arith.select %13, %15, %4 : vector<1x128xi1>, vector<1x128xi32>
    %c63_i32 = arith.constant 63 : i32
    %17 = vector.broadcast %c63_i32 : i32 to vector<1x128xi32>
    %18 = arith.cmpi slt, %16, %17 : vector<1x128xi32>
    %c62_i32 = arith.constant 62 : i32
    %19 = vector.broadcast %c62_i32 : i32 to vector<1x128xi32>
    %20 = arith.cmpi slt, %16, %19 : vector<1x128xi32>
    %c61_i32 = arith.constant 61 : i32
    %21 = vector.broadcast %c61_i32 : i32 to vector<1x128xi32>
    %22 = arith.cmpi slt, %16, %21 : vector<1x128xi32>
    %c60_i32 = arith.constant 60 : i32
    %23 = vector.broadcast %c60_i32 : i32 to vector<1x128xi32>
    %24 = arith.cmpi slt, %16, %23 : vector<1x128xi32>
    %c58_i32 = arith.constant 58 : i32
    %25 = vector.broadcast %c58_i32 : i32 to vector<1x128xi32>
    %26 = arith.cmpi slt, %16, %25 : vector<1x128xi32>
    %c1_i32_3 = arith.constant 1 : i32
    %27 = vector.broadcast %c1_i32_3 : i32 to vector<1x128xi32>
    %28 = arith.cmpi sge, %16, %27 : vector<1x128xi32>
    %c6_i32 = arith.constant 6 : i32
    %29 = vector.broadcast %c6_i32 : i32 to vector<1x128xi32>
    %30 = arith.cmpi sge, %16, %29 : vector<1x128xi32>
    %c4_i32 = arith.constant 4 : i32
    %31 = vector.broadcast %c4_i32 : i32 to vector<1x128xi32>
    %32 = arith.cmpi sge, %16, %31 : vector<1x128xi32>
    %c3_i32 = arith.constant 3 : i32
    %33 = vector.broadcast %c3_i32 : i32 to vector<1x128xi32>
    %34 = arith.cmpi sge, %16, %33 : vector<1x128xi32>
    %c2_i32 = arith.constant 2 : i32
    %35 = vector.broadcast %c2_i32 : i32 to vector<1x128xi32>
    %36 = arith.cmpi sge, %16, %35 : vector<1x128xi32>
    %c0 = arith.constant 0 : index
    %c0_4 = arith.constant 0 : index
    %37 = vector.load %arg0[%c0, %c0_4] : memref<2x128xf32, #tpu.memory_space<vmem>>, vector<2x128xf32>
    %c6_i32_5 = arith.constant 6 : i32
    %38 = tpu.dynamic_rotate %37 by %c6_i32_5 dim 1 : vector<2x128xf32>, i32 -> vector<2x128xf32>
    %c70_i32 = arith.constant 70 : i32
    %39 = tpu.dynamic_rotate %37 by %c70_i32 dim 1 : vector<2x128xf32>, i32 -> vector<2x128xf32>
    %40 = vector.shape_cast %30 : vector<1x128xi1> to vector<1x128xi1>
    %41 = vector.broadcast %40 : vector<1x128xi1> to vector<2x128xi1>
    %42 = arith.select %41, %38, %39 : vector<2x128xi1>, vector<2x128xf32>
    %c4_i32_6 = arith.constant 4 : i32
    %43 = tpu.dynamic_rotate %37 by %c4_i32_6 dim 1 : vector<2x128xf32>, i32 -> vector<2x128xf32>
    %c68_i32 = arith.constant 68 : i32
    %44 = tpu.dynamic_rotate %37 by %c68_i32 dim 1 : vector<2x128xf32>, i32 -> vector<2x128xf32>
    %45 = vector.shape_cast %32 : vector<1x128xi1> to vector<1x128xi1>
    %46 = vector.broadcast %45 : vector<1x128xi1> to vector<2x128xi1>
    %47 = arith.select %46, %43, %44 : vector<2x128xi1>, vector<2x128xf32>
    %c3_i32_7 = arith.constant 3 : i32
    %48 = tpu.dynamic_rotate %37 by %c3_i32_7 dim 1 : vector<2x128xf32>, i32 -> vector<2x128xf32>
    %c67_i32 = arith.constant 67 : i32
    %49 = tpu.dynamic_rotate %37 by %c67_i32 dim 1 : vector<2x128xf32>, i32 -> vector<2x128xf32>
    %50 = vector.shape_cast %34 : vector<1x128xi1> to vector<1x128xi1>
    %51 = vector.broadcast %50 : vector<1x128xi1> to vector<2x128xi1>
    %52 = arith.select %51, %48, %49 : vector<2x128xi1>, vector<2x128xf32>
    %c2_i32_8 = arith.constant 2 : i32
    %53 = tpu.dynamic_rotate %37 by %c2_i32_8 dim 1 : vector<2x128xf32>, i32 -> vector<2x128xf32>
    %c66_i32 = arith.constant 66 : i32
    %54 = tpu.dynamic_rotate %37 by %c66_i32 dim 1 : vector<2x128xf32>, i32 -> vector<2x128xf32>
    %55 = vector.shape_cast %36 : vector<1x128xi1> to vector<1x128xi1>
    %56 = vector.broadcast %55 : vector<1x128xi1> to vector<2x128xi1>
    %57 = arith.select %56, %53, %54 : vector<2x128xi1>, vector<2x128xf32>
    %c1_i32_9 = arith.constant 1 : i32
    %58 = tpu.dynamic_rotate %37 by %c1_i32_9 dim 1 : vector<2x128xf32>, i32 -> vector<2x128xf32>
    %c65_i32 = arith.constant 65 : i32
    %59 = tpu.dynamic_rotate %37 by %c65_i32 dim 1 : vector<2x128xf32>, i32 -> vector<2x128xf32>
    %60 = vector.shape_cast %28 : vector<1x128xi1> to vector<1x128xi1>
    %61 = vector.broadcast %60 : vector<1x128xi1> to vector<2x128xi1>
    %62 = arith.select %61, %58, %59 : vector<2x128xi1>, vector<2x128xf32>
    %c127_i32 = arith.constant 127 : i32
    %63 = tpu.dynamic_rotate %37 by %c127_i32 dim 1 : vector<2x128xf32>, i32 -> vector<2x128xf32>
    %c63_i32_10 = arith.constant 63 : i32
    %64 = tpu.dynamic_rotate %37 by %c63_i32_10 dim 1 : vector<2x128xf32>, i32 -> vector<2x128xf32>
    %65 = vector.shape_cast %18 : vector<1x128xi1> to vector<1x128xi1>
    %66 = vector.broadcast %65 : vector<1x128xi1> to vector<2x128xi1>
    %67 = arith.select %66, %63, %64 : vector<2x128xi1>, vector<2x128xf32>
    %c126_i32 = arith.constant 126 : i32
    %68 = tpu.dynamic_rotate %37 by %c126_i32 dim 1 : vector<2x128xf32>, i32 -> vector<2x128xf32>
    %c62_i32_11 = arith.constant 62 : i32
    %69 = tpu.dynamic_rotate %37 by %c62_i32_11 dim 1 : vector<2x128xf32>, i32 -> vector<2x128xf32>
    %70 = vector.shape_cast %20 : vector<1x128xi1> to vector<1x128xi1>
    %71 = vector.broadcast %70 : vector<1x128xi1> to vector<2x128xi1>
    %72 = arith.select %71, %68, %69 : vector<2x128xi1>, vector<2x128xf32>
    %c125_i32 = arith.constant 125 : i32
    %73 = tpu.dynamic_rotate %37 by %c125_i32 dim 1 : vector<2x128xf32>, i32 -> vector<2x128xf32>
    %c61_i32_12 = arith.constant 61 : i32
    %74 = tpu.dynamic_rotate %37 by %c61_i32_12 dim 1 : vector<2x128xf32>, i32 -> vector<2x128xf32>
    %75 = vector.shape_cast %22 : vector<1x128xi1> to vector<1x128xi1>
    %76 = vector.broadcast %75 : vector<1x128xi1> to vector<2x128xi1>
    %77 = arith.select %76, %73, %74 : vector<2x128xi1>, vector<2x128xf32>
    %c124_i32 = arith.constant 124 : i32
    %78 = tpu.dynamic_rotate %37 by %c124_i32 dim 1 : vector<2x128xf32>, i32 -> vector<2x128xf32>
    %c60_i32_13 = arith.constant 60 : i32
    %79 = tpu.dynamic_rotate %37 by %c60_i32_13 dim 1 : vector<2x128xf32>, i32 -> vector<2x128xf32>
    %80 = vector.shape_cast %24 : vector<1x128xi1> to vector<1x128xi1>
    %81 = vector.broadcast %80 : vector<1x128xi1> to vector<2x128xi1>
    %82 = arith.select %81, %78, %79 : vector<2x128xi1>, vector<2x128xf32>
    %c122_i32 = arith.constant 122 : i32
    %83 = tpu.dynamic_rotate %37 by %c122_i32 dim 1 : vector<2x128xf32>, i32 -> vector<2x128xf32>
    %c58_i32_14 = arith.constant 58 : i32
    %84 = tpu.dynamic_rotate %37 by %c58_i32_14 dim 1 : vector<2x128xf32>, i32 -> vector<2x128xf32>
    %85 = vector.shape_cast %26 : vector<1x128xi1> to vector<1x128xi1>
    %86 = vector.broadcast %85 : vector<1x128xi1> to vector<2x128xi1>
    %87 = arith.select %86, %83, %84 : vector<2x128xi1>, vector<2x128xf32>
    %88 = tpu.concatenate %42, %47, %52, %57, %62, %37, %67, %72, %77, %82, %87 in 0 : vector<2x128xf32>, vector<2x128xf32>, vector<2x128xf32>, vector<2x128xf32>, vector<2x128xf32>, vector<2x128xf32>, vector<2x128xf32>, vector<2x128xf32>, vector<2x128xf32>, vector<2x128xf32>, vector<2x128xf32> -> vector<22x128xf32>
    %c0_15 = arith.constant 0 : index
    %c0_16 = arith.constant 0 : index
    %89 = vector.load %arg1[%c0_15, %c0_16] : memref<18x22xf32, #tpu.memory_space<vmem>>, vector<18x22xf32>
    %cst = arith.constant dense<0.000000e+00> : vector<18x128xf32>
    %90 = tpu.matmul %89, %88, %cst {dimension_numbers = #tpu.dot_dimension_numbers<[1], [0], [0], [1], [0, 0, 1, 1], [], []>} : vector<18x22xf32>, vector<22x128xf32>, vector<18x128xf32> -> vector<18x128xf32>
    %c0_17 = arith.constant 0 : index
    %c0_18 = arith.constant 0 : index
    %91 = vector.load %arg2[%c0_17, %c0_18] : memref<18x1xf32, #tpu.memory_space<vmem>>, vector<18x1xf32>
    %92 = vector.broadcast %91 : vector<18x1xf32> to vector<18x128xf32>
    %93 = arith.addf %90, %92 : vector<18x128xf32>
    %cst_19 = arith.constant 0.000000e+00 : f32
    %94 = vector.broadcast %cst_19 : f32 to vector<18x128xf32>
    %95 = arith.maximumf %93, %94 : vector<18x128xf32>
    %cst_20 = arith.constant dense<0.000000e+00> : vector<18xf32>
    %96 = vector.multi_reduction <add>, %95, %cst_20 [1] : vector<18x128xf32> to vector<18xf32>
    %97 = vector.shape_cast %96 : vector<18xf32> to vector<18x1xf32>
    %cst_21 = arith.constant 1.280000e+02 : f32
    %98 = vector.broadcast %cst_21 : f32 to vector<18x1xf32>
    %99 = arith.divf %97, %98 : vector<18x1xf32>
    %100 = vector.broadcast %99 : vector<18x1xf32> to vector<18x128xf32>
    %101 = arith.subf %95, %100 : vector<18x128xf32>
    %102 = arith.mulf %101, %101 : vector<18x128xf32>
    %cst_22 = arith.constant dense<0.000000e+00> : vector<18xf32>
    %103 = vector.multi_reduction <add>, %102, %cst_22 [1] : vector<18x128xf32> to vector<18xf32>
    %104 = vector.shape_cast %103 : vector<18xf32> to vector<18x1xf32>
    %cst_23 = arith.constant 1.280000e+02 : f32
    %105 = vector.broadcast %cst_23 : f32 to vector<18x1xf32>
    %106 = arith.divf %104, %105 : vector<18x1xf32>
    %c0_24 = arith.constant 0 : index
    %c0_25 = arith.constant 0 : index
    %107 = vector.load %arg3[%c0_24, %c0_25] : memref<18x1xf32, #tpu.memory_space<vmem>>, vector<18x1xf32>
    %cst_26 = arith.constant 9.99999974E-6 : f32
    %108 = vector.broadcast %cst_26 : f32 to vector<18x1xf32>
    %109 = arith.addf %106, %108 : vector<18x1xf32>
    %110 = math.rsqrt %109 : vector<18x1xf32>
    %111 = arith.mulf %107, %110 : vector<18x1xf32>
    %112 = vector.broadcast %99 : vector<18x1xf32> to vector<18x128xf32>
    %113 = arith.subf %95, %112 : vector<18x128xf32>
    %114 = vector.broadcast %111 : vector<18x1xf32> to vector<18x128xf32>
    %115 = arith.mulf %113, %114 : vector<18x128xf32>
    %c0_27 = arith.constant 0 : index
    %c0_28 = arith.constant 0 : index
    %116 = vector.load %arg4[%c0_27, %c0_28] : memref<18x1xf32, #tpu.memory_space<vmem>>, vector<18x1xf32>
    %117 = vector.broadcast %116 : vector<18x1xf32> to vector<18x128xf32>
    %118 = arith.addf %115, %117 : vector<18x128xf32>
    %c6_i32_29 = arith.constant 6 : i32
    %119 = tpu.dynamic_rotate %118 by %c6_i32_29 dim 1 : vector<18x128xf32>, i32 -> vector<18x128xf32>
    %c70_i32_30 = arith.constant 70 : i32
    %120 = tpu.dynamic_rotate %118 by %c70_i32_30 dim 1 : vector<18x128xf32>, i32 -> vector<18x128xf32>
    %121 = vector.shape_cast %30 : vector<1x128xi1> to vector<1x128xi1>
    %122 = vector.broadcast %121 : vector<1x128xi1> to vector<18x128xi1>
    %123 = arith.select %122, %119, %120 : vector<18x128xi1>, vector<18x128xf32>
    %c4_i32_31 = arith.constant 4 : i32
    %124 = tpu.dynamic_rotate %118 by %c4_i32_31 dim 1 : vector<18x128xf32>, i32 -> vector<18x128xf32>
    %c68_i32_32 = arith.constant 68 : i32
    %125 = tpu.dynamic_rotate %118 by %c68_i32_32 dim 1 : vector<18x128xf32>, i32 -> vector<18x128xf32>
    %126 = vector.shape_cast %32 : vector<1x128xi1> to vector<1x128xi1>
    %127 = vector.broadcast %126 : vector<1x128xi1> to vector<18x128xi1>
    %128 = arith.select %127, %124, %125 : vector<18x128xi1>, vector<18x128xf32>
    %c3_i32_33 = arith.constant 3 : i32
    %129 = tpu.dynamic_rotate %118 by %c3_i32_33 dim 1 : vector<18x128xf32>, i32 -> vector<18x128xf32>
    %c67_i32_34 = arith.constant 67 : i32
    %130 = tpu.dynamic_rotate %118 by %c67_i32_34 dim 1 : vector<18x128xf32>, i32 -> vector<18x128xf32>
    %131 = vector.shape_cast %34 : vector<1x128xi1> to vector<1x128xi1>
    %132 = vector.broadcast %131 : vector<1x128xi1> to vector<18x128xi1>
    %133 = arith.select %132, %129, %130 : vector<18x128xi1>, vector<18x128xf32>
    %c2_i32_35 = arith.constant 2 : i32
    %134 = tpu.dynamic_rotate %118 by %c2_i32_35 dim 1 : vector<18x128xf32>, i32 -> vector<18x128xf32>
    %c66_i32_36 = arith.constant 66 : i32
    %135 = tpu.dynamic_rotate %118 by %c66_i32_36 dim 1 : vector<18x128xf32>, i32 -> vector<18x128xf32>
    %136 = vector.shape_cast %36 : vector<1x128xi1> to vector<1x128xi1>
    %137 = vector.broadcast %136 : vector<1x128xi1> to vector<18x128xi1>
    %138 = arith.select %137, %134, %135 : vector<18x128xi1>, vector<18x128xf32>
    %c1_i32_37 = arith.constant 1 : i32
    %139 = tpu.dynamic_rotate %118 by %c1_i32_37 dim 1 : vector<18x128xf32>, i32 -> vector<18x128xf32>
    %c65_i32_38 = arith.constant 65 : i32
    %140 = tpu.dynamic_rotate %118 by %c65_i32_38 dim 1 : vector<18x128xf32>, i32 -> vector<18x128xf32>
    %141 = vector.shape_cast %28 : vector<1x128xi1> to vector<1x128xi1>
    %142 = vector.broadcast %141 : vector<1x128xi1> to vector<18x128xi1>
    %143 = arith.select %142, %139, %140 : vector<18x128xi1>, vector<18x128xf32>
    %c127_i32_39 = arith.constant 127 : i32
    %144 = tpu.dynamic_rotate %118 by %c127_i32_39 dim 1 : vector<18x128xf32>, i32 -> vector<18x128xf32>
    %c63_i32_40 = arith.constant 63 : i32
    %145 = tpu.dynamic_rotate %118 by %c63_i32_40 dim 1 : vector<18x128xf32>, i32 -> vector<18x128xf32>
    %146 = vector.shape_cast %18 : vector<1x128xi1> to vector<1x128xi1>
    %147 = vector.broadcast %146 : vector<1x128xi1> to vector<18x128xi1>
    %148 = arith.select %147, %144, %145 : vector<18x128xi1>, vector<18x128xf32>
    %c126_i32_41 = arith.constant 126 : i32
    %149 = tpu.dynamic_rotate %118 by %c126_i32_41 dim 1 : vector<18x128xf32>, i32 -> vector<18x128xf32>
    %c62_i32_42 = arith.constant 62 : i32
    %150 = tpu.dynamic_rotate %118 by %c62_i32_42 dim 1 : vector<18x128xf32>, i32 -> vector<18x128xf32>
    %151 = vector.shape_cast %20 : vector<1x128xi1> to vector<1x128xi1>
    %152 = vector.broadcast %151 : vector<1x128xi1> to vector<18x128xi1>
    %153 = arith.select %152, %149, %150 : vector<18x128xi1>, vector<18x128xf32>
    %c125_i32_43 = arith.constant 125 : i32
    %154 = tpu.dynamic_rotate %118 by %c125_i32_43 dim 1 : vector<18x128xf32>, i32 -> vector<18x128xf32>
    %c61_i32_44 = arith.constant 61 : i32
    %155 = tpu.dynamic_rotate %118 by %c61_i32_44 dim 1 : vector<18x128xf32>, i32 -> vector<18x128xf32>
    %156 = vector.shape_cast %22 : vector<1x128xi1> to vector<1x128xi1>
    %157 = vector.broadcast %156 : vector<1x128xi1> to vector<18x128xi1>
    %158 = arith.select %157, %154, %155 : vector<18x128xi1>, vector<18x128xf32>
    %c124_i32_45 = arith.constant 124 : i32
    %159 = tpu.dynamic_rotate %118 by %c124_i32_45 dim 1 : vector<18x128xf32>, i32 -> vector<18x128xf32>
    %c60_i32_46 = arith.constant 60 : i32
    %160 = tpu.dynamic_rotate %118 by %c60_i32_46 dim 1 : vector<18x128xf32>, i32 -> vector<18x128xf32>
    %161 = vector.shape_cast %24 : vector<1x128xi1> to vector<1x128xi1>
    %162 = vector.broadcast %161 : vector<1x128xi1> to vector<18x128xi1>
    %163 = arith.select %162, %159, %160 : vector<18x128xi1>, vector<18x128xf32>
    %c122_i32_47 = arith.constant 122 : i32
    %164 = tpu.dynamic_rotate %118 by %c122_i32_47 dim 1 : vector<18x128xf32>, i32 -> vector<18x128xf32>
    %c58_i32_48 = arith.constant 58 : i32
    %165 = tpu.dynamic_rotate %118 by %c58_i32_48 dim 1 : vector<18x128xf32>, i32 -> vector<18x128xf32>
    %166 = vector.shape_cast %26 : vector<1x128xi1> to vector<1x128xi1>
    %167 = vector.broadcast %166 : vector<1x128xi1> to vector<18x128xi1>
    %168 = arith.select %167, %164, %165 : vector<18x128xi1>, vector<18x128xf32>
    %169 = tpu.concatenate %123, %128, %133, %138, %143, %118, %148, %153, %158, %163, %168 in 0 : vector<18x128xf32>, vector<18x128xf32>, vector<18x128xf32>, vector<18x128xf32>, vector<18x128xf32>, vector<18x128xf32>, vector<18x128xf32>, vector<18x128xf32>, vector<18x128xf32>, vector<18x128xf32>, vector<18x128xf32> -> vector<198x128xf32>
    %c0_49 = arith.constant 0 : index
    %c0_50 = arith.constant 0 : index
    %170 = vector.load %arg5[%c0_49, %c0_50] : memref<20x198xf32, #tpu.memory_space<vmem>>, vector<20x198xf32>
    %cst_51 = arith.constant dense<0.000000e+00> : vector<20x128xf32>
    %171 = tpu.matmul %170, %169, %cst_51 {dimension_numbers = #tpu.dot_dimension_numbers<[1], [0], [0], [1], [0, 0, 1, 1], [], []>} : vector<20x198xf32>, vector<198x128xf32>, vector<20x128xf32> -> vector<20x128xf32>
    %c0_52 = arith.constant 0 : index
    %c0_53 = arith.constant 0 : index
    %172 = vector.load %arg6[%c0_52, %c0_53] : memref<20x1xf32, #tpu.memory_space<vmem>>, vector<20x1xf32>
    %173 = vector.broadcast %172 : vector<20x1xf32> to vector<20x128xf32>
    %174 = arith.addf %171, %173 : vector<20x128xf32>
    %cst_54 = arith.constant 0.000000e+00 : f32
    %175 = vector.broadcast %cst_54 : f32 to vector<20x128xf32>
    %176 = arith.maximumf %174, %175 : vector<20x128xf32>
    %cst_55 = arith.constant dense<0.000000e+00> : vector<20xf32>
    %177 = vector.multi_reduction <add>, %176, %cst_55 [1] : vector<20x128xf32> to vector<20xf32>
    %178 = vector.shape_cast %177 : vector<20xf32> to vector<20x1xf32>
    %cst_56 = arith.constant 1.280000e+02 : f32
    %179 = vector.broadcast %cst_56 : f32 to vector<20x1xf32>
    %180 = arith.divf %178, %179 : vector<20x1xf32>
    %181 = vector.broadcast %180 : vector<20x1xf32> to vector<20x128xf32>
    %182 = arith.subf %176, %181 : vector<20x128xf32>
    %183 = arith.mulf %182, %182 : vector<20x128xf32>
    %cst_57 = arith.constant dense<0.000000e+00> : vector<20xf32>
    %184 = vector.multi_reduction <add>, %183, %cst_57 [1] : vector<20x128xf32> to vector<20xf32>
    %185 = vector.shape_cast %184 : vector<20xf32> to vector<20x1xf32>
    %cst_58 = arith.constant 1.280000e+02 : f32
    %186 = vector.broadcast %cst_58 : f32 to vector<20x1xf32>
    %187 = arith.divf %185, %186 : vector<20x1xf32>
    %c0_59 = arith.constant 0 : index
    %c0_60 = arith.constant 0 : index
    %188 = vector.load %arg7[%c0_59, %c0_60] : memref<20x1xf32, #tpu.memory_space<vmem>>, vector<20x1xf32>
    %cst_61 = arith.constant 9.99999974E-6 : f32
    %189 = vector.broadcast %cst_61 : f32 to vector<20x1xf32>
    %190 = arith.addf %187, %189 : vector<20x1xf32>
    %191 = math.rsqrt %190 : vector<20x1xf32>
    %192 = arith.mulf %188, %191 : vector<20x1xf32>
    %193 = vector.broadcast %180 : vector<20x1xf32> to vector<20x128xf32>
    %194 = arith.subf %176, %193 : vector<20x128xf32>
    %195 = vector.broadcast %192 : vector<20x1xf32> to vector<20x128xf32>
    %196 = arith.mulf %194, %195 : vector<20x128xf32>
    %c0_62 = arith.constant 0 : index
    %c0_63 = arith.constant 0 : index
    %197 = vector.load %arg8[%c0_62, %c0_63] : memref<20x1xf32, #tpu.memory_space<vmem>>, vector<20x1xf32>
    %198 = vector.broadcast %197 : vector<20x1xf32> to vector<20x128xf32>
    %199 = arith.addf %196, %198 : vector<20x128xf32>
    %c6_i32_64 = arith.constant 6 : i32
    %200 = tpu.dynamic_rotate %199 by %c6_i32_64 dim 1 : vector<20x128xf32>, i32 -> vector<20x128xf32>
    %c70_i32_65 = arith.constant 70 : i32
    %201 = tpu.dynamic_rotate %199 by %c70_i32_65 dim 1 : vector<20x128xf32>, i32 -> vector<20x128xf32>
    %202 = vector.shape_cast %30 : vector<1x128xi1> to vector<1x128xi1>
    %203 = vector.broadcast %202 : vector<1x128xi1> to vector<20x128xi1>
    %204 = arith.select %203, %200, %201 : vector<20x128xi1>, vector<20x128xf32>
    %c4_i32_66 = arith.constant 4 : i32
    %205 = tpu.dynamic_rotate %199 by %c4_i32_66 dim 1 : vector<20x128xf32>, i32 -> vector<20x128xf32>
    %c68_i32_67 = arith.constant 68 : i32
    %206 = tpu.dynamic_rotate %199 by %c68_i32_67 dim 1 : vector<20x128xf32>, i32 -> vector<20x128xf32>
    %207 = vector.shape_cast %32 : vector<1x128xi1> to vector<1x128xi1>
    %208 = vector.broadcast %207 : vector<1x128xi1> to vector<20x128xi1>
    %209 = arith.select %208, %205, %206 : vector<20x128xi1>, vector<20x128xf32>
    %c3_i32_68 = arith.constant 3 : i32
    %210 = tpu.dynamic_rotate %199 by %c3_i32_68 dim 1 : vector<20x128xf32>, i32 -> vector<20x128xf32>
    %c67_i32_69 = arith.constant 67 : i32
    %211 = tpu.dynamic_rotate %199 by %c67_i32_69 dim 1 : vector<20x128xf32>, i32 -> vector<20x128xf32>
    %212 = vector.shape_cast %34 : vector<1x128xi1> to vector<1x128xi1>
    %213 = vector.broadcast %212 : vector<1x128xi1> to vector<20x128xi1>
    %214 = arith.select %213, %210, %211 : vector<20x128xi1>, vector<20x128xf32>
    %c2_i32_70 = arith.constant 2 : i32
    %215 = tpu.dynamic_rotate %199 by %c2_i32_70 dim 1 : vector<20x128xf32>, i32 -> vector<20x128xf32>
    %c66_i32_71 = arith.constant 66 : i32
    %216 = tpu.dynamic_rotate %199 by %c66_i32_71 dim 1 : vector<20x128xf32>, i32 -> vector<20x128xf32>
    %217 = vector.shape_cast %36 : vector<1x128xi1> to vector<1x128xi1>
    %218 = vector.broadcast %217 : vector<1x128xi1> to vector<20x128xi1>
    %219 = arith.select %218, %215, %216 : vector<20x128xi1>, vector<20x128xf32>
    %c1_i32_72 = arith.constant 1 : i32
    %220 = tpu.dynamic_rotate %199 by %c1_i32_72 dim 1 : vector<20x128xf32>, i32 -> vector<20x128xf32>
    %c65_i32_73 = arith.constant 65 : i32
    %221 = tpu.dynamic_rotate %199 by %c65_i32_73 dim 1 : vector<20x128xf32>, i32 -> vector<20x128xf32>
    %222 = vector.shape_cast %28 : vector<1x128xi1> to vector<1x128xi1>
    %223 = vector.broadcast %222 : vector<1x128xi1> to vector<20x128xi1>
    %224 = arith.select %223, %220, %221 : vector<20x128xi1>, vector<20x128xf32>
    %c127_i32_74 = arith.constant 127 : i32
    %225 = tpu.dynamic_rotate %199 by %c127_i32_74 dim 1 : vector<20x128xf32>, i32 -> vector<20x128xf32>
    %c63_i32_75 = arith.constant 63 : i32
    %226 = tpu.dynamic_rotate %199 by %c63_i32_75 dim 1 : vector<20x128xf32>, i32 -> vector<20x128xf32>
    %227 = vector.shape_cast %18 : vector<1x128xi1> to vector<1x128xi1>
    %228 = vector.broadcast %227 : vector<1x128xi1> to vector<20x128xi1>
    %229 = arith.select %228, %225, %226 : vector<20x128xi1>, vector<20x128xf32>
    %c126_i32_76 = arith.constant 126 : i32
    %230 = tpu.dynamic_rotate %199 by %c126_i32_76 dim 1 : vector<20x128xf32>, i32 -> vector<20x128xf32>
    %c62_i32_77 = arith.constant 62 : i32
    %231 = tpu.dynamic_rotate %199 by %c62_i32_77 dim 1 : vector<20x128xf32>, i32 -> vector<20x128xf32>
    %232 = vector.shape_cast %20 : vector<1x128xi1> to vector<1x128xi1>
    %233 = vector.broadcast %232 : vector<1x128xi1> to vector<20x128xi1>
    %234 = arith.select %233, %230, %231 : vector<20x128xi1>, vector<20x128xf32>
    %c125_i32_78 = arith.constant 125 : i32
    %235 = tpu.dynamic_rotate %199 by %c125_i32_78 dim 1 : vector<20x128xf32>, i32 -> vector<20x128xf32>
    %c61_i32_79 = arith.constant 61 : i32
    %236 = tpu.dynamic_rotate %199 by %c61_i32_79 dim 1 : vector<20x128xf32>, i32 -> vector<20x128xf32>
    %237 = vector.shape_cast %22 : vector<1x128xi1> to vector<1x128xi1>
    %238 = vector.broadcast %237 : vector<1x128xi1> to vector<20x128xi1>
    %239 = arith.select %238, %235, %236 : vector<20x128xi1>, vector<20x128xf32>
    %c124_i32_80 = arith.constant 124 : i32
    %240 = tpu.dynamic_rotate %199 by %c124_i32_80 dim 1 : vector<20x128xf32>, i32 -> vector<20x128xf32>
    %c60_i32_81 = arith.constant 60 : i32
    %241 = tpu.dynamic_rotate %199 by %c60_i32_81 dim 1 : vector<20x128xf32>, i32 -> vector<20x128xf32>
    %242 = vector.shape_cast %24 : vector<1x128xi1> to vector<1x128xi1>
    %243 = vector.broadcast %242 : vector<1x128xi1> to vector<20x128xi1>
    %244 = arith.select %243, %240, %241 : vector<20x128xi1>, vector<20x128xf32>
    %c122_i32_82 = arith.constant 122 : i32
    %245 = tpu.dynamic_rotate %199 by %c122_i32_82 dim 1 : vector<20x128xf32>, i32 -> vector<20x128xf32>
    %c58_i32_83 = arith.constant 58 : i32
    %246 = tpu.dynamic_rotate %199 by %c58_i32_83 dim 1 : vector<20x128xf32>, i32 -> vector<20x128xf32>
    %247 = vector.shape_cast %26 : vector<1x128xi1> to vector<1x128xi1>
    %248 = vector.broadcast %247 : vector<1x128xi1> to vector<20x128xi1>
    %249 = arith.select %248, %245, %246 : vector<20x128xi1>, vector<20x128xf32>
    %250 = tpu.concatenate %204, %209, %214, %219, %224, %199, %229, %234, %239, %244, %249 in 0 : vector<20x128xf32>, vector<20x128xf32>, vector<20x128xf32>, vector<20x128xf32>, vector<20x128xf32>, vector<20x128xf32>, vector<20x128xf32>, vector<20x128xf32>, vector<20x128xf32>, vector<20x128xf32>, vector<20x128xf32> -> vector<220x128xf32>
    %c0_84 = arith.constant 0 : index
    %c0_85 = arith.constant 0 : index
    %251 = vector.load %arg9[%c0_84, %c0_85] : memref<20x220xf32, #tpu.memory_space<vmem>>, vector<20x220xf32>
    %cst_86 = arith.constant dense<0.000000e+00> : vector<20x128xf32>
    %252 = tpu.matmul %251, %250, %cst_86 {dimension_numbers = #tpu.dot_dimension_numbers<[1], [0], [0], [1], [0, 0, 1, 1], [], []>} : vector<20x220xf32>, vector<220x128xf32>, vector<20x128xf32> -> vector<20x128xf32>
    %c0_87 = arith.constant 0 : index
    %c0_88 = arith.constant 0 : index
    %253 = vector.load %arg10[%c0_87, %c0_88] : memref<20x1xf32, #tpu.memory_space<vmem>>, vector<20x1xf32>
    %254 = vector.broadcast %253 : vector<20x1xf32> to vector<20x128xf32>
    %255 = arith.addf %252, %254 : vector<20x128xf32>
    %cst_89 = arith.constant 0.000000e+00 : f32
    %256 = vector.broadcast %cst_89 : f32 to vector<20x128xf32>
    %257 = arith.maximumf %255, %256 : vector<20x128xf32>
    %cst_90 = arith.constant dense<0.000000e+00> : vector<20xf32>
    %258 = vector.multi_reduction <add>, %257, %cst_90 [1] : vector<20x128xf32> to vector<20xf32>
    %259 = vector.shape_cast %258 : vector<20xf32> to vector<20x1xf32>
    %cst_91 = arith.constant 1.280000e+02 : f32
    %260 = vector.broadcast %cst_91 : f32 to vector<20x1xf32>
    %261 = arith.divf %259, %260 : vector<20x1xf32>
    %262 = vector.broadcast %261 : vector<20x1xf32> to vector<20x128xf32>
    %263 = arith.subf %257, %262 : vector<20x128xf32>
    %264 = arith.mulf %263, %263 : vector<20x128xf32>
    %cst_92 = arith.constant dense<0.000000e+00> : vector<20xf32>
    %265 = vector.multi_reduction <add>, %264, %cst_92 [1] : vector<20x128xf32> to vector<20xf32>
    %266 = vector.shape_cast %265 : vector<20xf32> to vector<20x1xf32>
    %cst_93 = arith.constant 1.280000e+02 : f32
    %267 = vector.broadcast %cst_93 : f32 to vector<20x1xf32>
    %268 = arith.divf %266, %267 : vector<20x1xf32>
    %c0_94 = arith.constant 0 : index
    %c0_95 = arith.constant 0 : index
    %269 = vector.load %arg11[%c0_94, %c0_95] : memref<20x1xf32, #tpu.memory_space<vmem>>, vector<20x1xf32>
    %cst_96 = arith.constant 9.99999974E-6 : f32
    %270 = vector.broadcast %cst_96 : f32 to vector<20x1xf32>
    %271 = arith.addf %268, %270 : vector<20x1xf32>
    %272 = math.rsqrt %271 : vector<20x1xf32>
    %273 = arith.mulf %269, %272 : vector<20x1xf32>
    %274 = vector.broadcast %261 : vector<20x1xf32> to vector<20x128xf32>
    %275 = arith.subf %257, %274 : vector<20x128xf32>
    %276 = vector.broadcast %273 : vector<20x1xf32> to vector<20x128xf32>
    %277 = arith.mulf %275, %276 : vector<20x128xf32>
    %c0_97 = arith.constant 0 : index
    %c0_98 = arith.constant 0 : index
    %278 = vector.load %arg12[%c0_97, %c0_98] : memref<20x1xf32, #tpu.memory_space<vmem>>, vector<20x1xf32>
    %279 = vector.broadcast %278 : vector<20x1xf32> to vector<20x128xf32>
    %280 = arith.addf %277, %279 : vector<20x128xf32>
    %c6_i32_99 = arith.constant 6 : i32
    %281 = tpu.dynamic_rotate %280 by %c6_i32_99 dim 1 : vector<20x128xf32>, i32 -> vector<20x128xf32>
    %c70_i32_100 = arith.constant 70 : i32
    %282 = tpu.dynamic_rotate %280 by %c70_i32_100 dim 1 : vector<20x128xf32>, i32 -> vector<20x128xf32>
    %283 = vector.shape_cast %30 : vector<1x128xi1> to vector<1x128xi1>
    %284 = vector.broadcast %283 : vector<1x128xi1> to vector<20x128xi1>
    %285 = arith.select %284, %281, %282 : vector<20x128xi1>, vector<20x128xf32>
    %c4_i32_101 = arith.constant 4 : i32
    %286 = tpu.dynamic_rotate %280 by %c4_i32_101 dim 1 : vector<20x128xf32>, i32 -> vector<20x128xf32>
    %c68_i32_102 = arith.constant 68 : i32
    %287 = tpu.dynamic_rotate %280 by %c68_i32_102 dim 1 : vector<20x128xf32>, i32 -> vector<20x128xf32>
    %288 = vector.shape_cast %32 : vector<1x128xi1> to vector<1x128xi1>
    %289 = vector.broadcast %288 : vector<1x128xi1> to vector<20x128xi1>
    %290 = arith.select %289, %286, %287 : vector<20x128xi1>, vector<20x128xf32>
    %c3_i32_103 = arith.constant 3 : i32
    %291 = tpu.dynamic_rotate %280 by %c3_i32_103 dim 1 : vector<20x128xf32>, i32 -> vector<20x128xf32>
    %c67_i32_104 = arith.constant 67 : i32
    %292 = tpu.dynamic_rotate %280 by %c67_i32_104 dim 1 : vector<20x128xf32>, i32 -> vector<20x128xf32>
    %293 = vector.shape_cast %34 : vector<1x128xi1> to vector<1x128xi1>
    %294 = vector.broadcast %293 : vector<1x128xi1> to vector<20x128xi1>
    %295 = arith.select %294, %291, %292 : vector<20x128xi1>, vector<20x128xf32>
    %c2_i32_105 = arith.constant 2 : i32
    %296 = tpu.dynamic_rotate %280 by %c2_i32_105 dim 1 : vector<20x128xf32>, i32 -> vector<20x128xf32>
    %c66_i32_106 = arith.constant 66 : i32
    %297 = tpu.dynamic_rotate %280 by %c66_i32_106 dim 1 : vector<20x128xf32>, i32 -> vector<20x128xf32>
    %298 = vector.shape_cast %36 : vector<1x128xi1> to vector<1x128xi1>
    %299 = vector.broadcast %298 : vector<1x128xi1> to vector<20x128xi1>
    %300 = arith.select %299, %296, %297 : vector<20x128xi1>, vector<20x128xf32>
    %c1_i32_107 = arith.constant 1 : i32
    %301 = tpu.dynamic_rotate %280 by %c1_i32_107 dim 1 : vector<20x128xf32>, i32 -> vector<20x128xf32>
    %c65_i32_108 = arith.constant 65 : i32
    %302 = tpu.dynamic_rotate %280 by %c65_i32_108 dim 1 : vector<20x128xf32>, i32 -> vector<20x128xf32>
    %303 = vector.shape_cast %28 : vector<1x128xi1> to vector<1x128xi1>
    %304 = vector.broadcast %303 : vector<1x128xi1> to vector<20x128xi1>
    %305 = arith.select %304, %301, %302 : vector<20x128xi1>, vector<20x128xf32>
    %c127_i32_109 = arith.constant 127 : i32
    %306 = tpu.dynamic_rotate %280 by %c127_i32_109 dim 1 : vector<20x128xf32>, i32 -> vector<20x128xf32>
    %c63_i32_110 = arith.constant 63 : i32
    %307 = tpu.dynamic_rotate %280 by %c63_i32_110 dim 1 : vector<20x128xf32>, i32 -> vector<20x128xf32>
    %308 = vector.shape_cast %18 : vector<1x128xi1> to vector<1x128xi1>
    %309 = vector.broadcast %308 : vector<1x128xi1> to vector<20x128xi1>
    %310 = arith.select %309, %306, %307 : vector<20x128xi1>, vector<20x128xf32>
    %c126_i32_111 = arith.constant 126 : i32
    %311 = tpu.dynamic_rotate %280 by %c126_i32_111 dim 1 : vector<20x128xf32>, i32 -> vector<20x128xf32>
    %c62_i32_112 = arith.constant 62 : i32
    %312 = tpu.dynamic_rotate %280 by %c62_i32_112 dim 1 : vector<20x128xf32>, i32 -> vector<20x128xf32>
    %313 = vector.shape_cast %20 : vector<1x128xi1> to vector<1x128xi1>
    %314 = vector.broadcast %313 : vector<1x128xi1> to vector<20x128xi1>
    %315 = arith.select %314, %311, %312 : vector<20x128xi1>, vector<20x128xf32>
    %c125_i32_113 = arith.constant 125 : i32
    %316 = tpu.dynamic_rotate %280 by %c125_i32_113 dim 1 : vector<20x128xf32>, i32 -> vector<20x128xf32>
    %c61_i32_114 = arith.constant 61 : i32
    %317 = tpu.dynamic_rotate %280 by %c61_i32_114 dim 1 : vector<20x128xf32>, i32 -> vector<20x128xf32>
    %318 = vector.shape_cast %22 : vector<1x128xi1> to vector<1x128xi1>
    %319 = vector.broadcast %318 : vector<1x128xi1> to vector<20x128xi1>
    %320 = arith.select %319, %316, %317 : vector<20x128xi1>, vector<20x128xf32>
    %c124_i32_115 = arith.constant 124 : i32
    %321 = tpu.dynamic_rotate %280 by %c124_i32_115 dim 1 : vector<20x128xf32>, i32 -> vector<20x128xf32>
    %c60_i32_116 = arith.constant 60 : i32
    %322 = tpu.dynamic_rotate %280 by %c60_i32_116 dim 1 : vector<20x128xf32>, i32 -> vector<20x128xf32>
    %323 = vector.shape_cast %24 : vector<1x128xi1> to vector<1x128xi1>
    %324 = vector.broadcast %323 : vector<1x128xi1> to vector<20x128xi1>
    %325 = arith.select %324, %321, %322 : vector<20x128xi1>, vector<20x128xf32>
    %c122_i32_117 = arith.constant 122 : i32
    %326 = tpu.dynamic_rotate %280 by %c122_i32_117 dim 1 : vector<20x128xf32>, i32 -> vector<20x128xf32>
    %c58_i32_118 = arith.constant 58 : i32
    %327 = tpu.dynamic_rotate %280 by %c58_i32_118 dim 1 : vector<20x128xf32>, i32 -> vector<20x128xf32>
    %328 = vector.shape_cast %26 : vector<1x128xi1> to vector<1x128xi1>
    %329 = vector.broadcast %328 : vector<1x128xi1> to vector<20x128xi1>
    %330 = arith.select %329, %326, %327 : vector<20x128xi1>, vector<20x128xf32>
    %331 = tpu.concatenate %285, %290, %295, %300, %305, %280, %310, %315, %320, %325, %330 in 0 : vector<20x128xf32>, vector<20x128xf32>, vector<20x128xf32>, vector<20x128xf32>, vector<20x128xf32>, vector<20x128xf32>, vector<20x128xf32>, vector<20x128xf32>, vector<20x128xf32>, vector<20x128xf32>, vector<20x128xf32> -> vector<220x128xf32>
    %c0_119 = arith.constant 0 : index
    %c0_120 = arith.constant 0 : index
    %332 = vector.load %arg13[%c0_119, %c0_120] : memref<20x220xf32, #tpu.memory_space<vmem>>, vector<20x220xf32>
    %cst_121 = arith.constant dense<0.000000e+00> : vector<20x128xf32>
    %333 = tpu.matmul %332, %331, %cst_121 {dimension_numbers = #tpu.dot_dimension_numbers<[1], [0], [0], [1], [0, 0, 1, 1], [], []>} : vector<20x220xf32>, vector<220x128xf32>, vector<20x128xf32> -> vector<20x128xf32>
    %c0_122 = arith.constant 0 : index
    %c0_123 = arith.constant 0 : index
    %334 = vector.load %arg14[%c0_122, %c0_123] : memref<20x1xf32, #tpu.memory_space<vmem>>, vector<20x1xf32>
    %335 = vector.broadcast %334 : vector<20x1xf32> to vector<20x128xf32>
    %336 = arith.addf %333, %335 : vector<20x128xf32>
    %cst_124 = arith.constant 0.000000e+00 : f32
    %337 = vector.broadcast %cst_124 : f32 to vector<20x128xf32>
    %338 = arith.maximumf %336, %337 : vector<20x128xf32>
    %cst_125 = arith.constant dense<0.000000e+00> : vector<20xf32>
    %339 = vector.multi_reduction <add>, %338, %cst_125 [1] : vector<20x128xf32> to vector<20xf32>
    %340 = vector.shape_cast %339 : vector<20xf32> to vector<20x1xf32>
    %cst_126 = arith.constant 1.280000e+02 : f32
    %341 = vector.broadcast %cst_126 : f32 to vector<20x1xf32>
    %342 = arith.divf %340, %341 : vector<20x1xf32>
    %343 = vector.broadcast %342 : vector<20x1xf32> to vector<20x128xf32>
    %344 = arith.subf %338, %343 : vector<20x128xf32>
    %345 = arith.mulf %344, %344 : vector<20x128xf32>
    %cst_127 = arith.constant dense<0.000000e+00> : vector<20xf32>
    %346 = vector.multi_reduction <add>, %345, %cst_127 [1] : vector<20x128xf32> to vector<20xf32>
    %347 = vector.shape_cast %346 : vector<20xf32> to vector<20x1xf32>
    %cst_128 = arith.constant 1.280000e+02 : f32
    %348 = vector.broadcast %cst_128 : f32 to vector<20x1xf32>
    %349 = arith.divf %347, %348 : vector<20x1xf32>
    %c0_129 = arith.constant 0 : index
    %c0_130 = arith.constant 0 : index
    %350 = vector.load %arg15[%c0_129, %c0_130] : memref<20x1xf32, #tpu.memory_space<vmem>>, vector<20x1xf32>
    %cst_131 = arith.constant 9.99999974E-6 : f32
    %351 = vector.broadcast %cst_131 : f32 to vector<20x1xf32>
    %352 = arith.addf %349, %351 : vector<20x1xf32>
    %353 = math.rsqrt %352 : vector<20x1xf32>
    %354 = arith.mulf %350, %353 : vector<20x1xf32>
    %355 = vector.broadcast %342 : vector<20x1xf32> to vector<20x128xf32>
    %356 = arith.subf %338, %355 : vector<20x128xf32>
    %357 = vector.broadcast %354 : vector<20x1xf32> to vector<20x128xf32>
    %358 = arith.mulf %356, %357 : vector<20x128xf32>
    %c0_132 = arith.constant 0 : index
    %c0_133 = arith.constant 0 : index
    %359 = vector.load %arg16[%c0_132, %c0_133] : memref<20x1xf32, #tpu.memory_space<vmem>>, vector<20x1xf32>
    %360 = vector.broadcast %359 : vector<20x1xf32> to vector<20x128xf32>
    %361 = arith.addf %358, %360 : vector<20x128xf32>
    %c1_i32_134 = arith.constant 1 : i32
    %362 = tpu.dynamic_rotate %361 by %c1_i32_134 dim 1 : vector<20x128xf32>, i32 -> vector<20x128xf32>
    %cst_135 = arith.constant 0.000000e+00 : f32
    %363 = vector.shape_cast %28 : vector<1x128xi1> to vector<1x128xi1>
    %364 = vector.broadcast %363 : vector<1x128xi1> to vector<20x128xi1>
    %365 = vector.broadcast %cst_135 : f32 to vector<20x128xf32>
    %366 = arith.select %364, %362, %365 : vector<20x128xi1>, vector<20x128xf32>
    %c127_i32_136 = arith.constant 127 : i32
    %367 = tpu.dynamic_rotate %361 by %c127_i32_136 dim 1 : vector<20x128xf32>, i32 -> vector<20x128xf32>
    %cst_137 = arith.constant 0.000000e+00 : f32
    %368 = vector.shape_cast %18 : vector<1x128xi1> to vector<1x128xi1>
    %369 = vector.broadcast %368 : vector<1x128xi1> to vector<20x128xi1>
    %370 = vector.broadcast %cst_137 : f32 to vector<20x128xf32>
    %371 = arith.select %369, %367, %370 : vector<20x128xi1>, vector<20x128xf32>
    %372 = tpu.concatenate %366, %361, %371 in 0 : vector<20x128xf32>, vector<20x128xf32>, vector<20x128xf32> -> vector<60x128xf32>
    %c0_138 = arith.constant 0 : index
    %c0_139 = arith.constant 0 : index
    %373 = vector.load %arg17[%c0_138, %c0_139] : memref<4x60xf32, #tpu.memory_space<vmem>>, vector<4x60xf32>
    %cst_140 = arith.constant dense<0.000000e+00> : vector<4x128xf32>
    %374 = tpu.matmul %373, %372, %cst_140 {dimension_numbers = #tpu.dot_dimension_numbers<[1], [0], [0], [1], [0, 0, 1, 1], [], []>} : vector<4x60xf32>, vector<60x128xf32>, vector<4x128xf32> -> vector<4x128xf32>
    %c0_141 = arith.constant 0 : index
    %c0_142 = arith.constant 0 : index
    %375 = vector.load %arg18[%c0_141, %c0_142] : memref<4x1xf32, #tpu.memory_space<vmem>>, vector<4x1xf32>
    %376 = vector.broadcast %375 : vector<4x1xf32> to vector<4x128xf32>
    %377 = arith.addf %374, %376 : vector<4x128xf32>
    %c0_143 = arith.constant 0 : index
    %c0_144 = arith.constant 0 : index
    %378 = vector.load %arg19[%c0_143, %c0_144] : memref<6x128xf32, #tpu.memory_space<vmem>>, vector<4x128xf32>
    tpu.vector_store %arg19[%c0_143, %c0_144], %377 {strides = array<i32>} : memref<6x128xf32, #tpu.memory_space<vmem>>, vector<4x128xf32>,
    %c0_145 = arith.constant 0 : index
    %c0_146 = arith.constant 0 : index
    %379 = vector.load %arg0[%c0_145, %c0_146] : memref<2x128xf32, #tpu.memory_space<vmem>>, vector<2x128xf32>
    %c4 = arith.constant 4 : index
    %c0_147 = arith.constant 0 : index
    %380 = vector.load %arg19[%c4, %c0_147] : memref<6x128xf32, #tpu.memory_space<vmem>>, vector<2x128xf32>
    tpu.vector_store %arg19[%c4, %c0_147], %379 {strides = array<i32>} : memref<6x128xf32, #tpu.memory_space<vmem>>, vector<2x128xf32>,
    return
  }
}

</mosaic_0001>

<bundles_post_ra>
// kernel: starter_block_forward.1
= control target key start
LH: loop header
LB: loop body
LE: loop exit
PB: predicated region body
PF: predicated region fallthrough
CT: control target
= control target key end

     0   :  { %s3227_s21 = smov 122   ;;  %s3223_s22 = smov 127   ;;  %v62_v2 = vlaneseq  ;;  %vm181_vm3 = vcmask 1041408   ;;  %vm183_vm4 = vcmask 1043456   ;;  %vm185_vm5 = vcmask 1045504   ;;  %s3162_s0 = inlined_call_operand.vmem [shape: f32[2,128], index: 0, kind: input, shape index: {}]   ;;  %s3163_s2 = inlined_call_operand.vmem [shape: f32[18,1], index: 2, kind: input, shape index: {}]   ;;  %s3164_s1 = inlined_call_operand.vmem [shape: f32[18,22], index: 1, kind: input, shape index: {}]   ;;  %s3165_s4 = inlined_call_operand.vmem [shape: f32[18,1], index: 4, kind: input, shape index: {}]   ;;  %s3166_s3 = inlined_call_operand.vmem [shape: f32[18,1], index: 3, kind: input, shape index: {}]   ;;  %s3167_s6 = inlined_call_operand.vmem [shape: f32[20,1], index: 6, kind: input, shape index: {}]   ;;  %s3168_s5 = inlined_call_operand.vmem [shape: f32[20,198], index: 5, kind: input, shape index: {}]   ;;  %s3169_s8 = inlined_call_operand.vmem [shape: f32[20,1], index: 8, kind: input, shape index: {}]   ;;  %s3170_s7 = inlined_call_operand.vmem [shape: f32[20,1], index: 7, kind: input, shape index: {}]   ;;  %s3171_s10 = inlined_call_operand.vmem [shape: f32[20,1], index: 10, kind: input, shape index: {}]   ;;  %s3172_s9 = inlined_call_operand.vmem [shape: f32[20,220], index: 9, kind: input, shape index: {}]   ;;  %s3173_s12 = inlined_call_operand.vmem [shape: f32[20,1], index: 12, kind: input, shape index: {}]   ;;  %s3174_s11 = inlined_call_operand.vmem [shape: f32[20,1], index: 11, kind: input, shape index: {}]   ;;  %s3175_s14 = inlined_call_operand.vmem [shape: f32[20,1], index: 14, kind: input, shape index: {}]   ;;  %s3176_s13 = inlined_call_operand.vmem [shape: f32[20,220], index: 13, kind: input, shape index: {}]   ;;  %s3177_s16 = inlined_call_operand.vmem [shape: f32[20,1], index: 16, kind: input, shape index: {}]   ;;  %s3178_s15 = inlined_call_operand.vmem [shape: f32[20,1], index: 15, kind: input, shape index: {}]   ;;  %s3179_s18 = inlined_call_operand.vmem [shape: f32[4,1], index: 18, kind: input, shape index: {}]   ;;  %s3180_s17 = inlined_call_operand.vmem [shape: f32[4,60], index: 17, kind: input, shape index: {}]   ;;  %s3181_s19 = inlined_call_operand.vmem [shape: f32[6,128], index: 19, kind: output, shape index: {}]  }
   0x1   :  { %3233 = sst [smem:[#allocation2_spill]] %s3162_s0  ;;  %s3217_s23 = smov 60   ;;  %v2073_v28 = vmov 0   ;;  %vm213_vm13 = vcmask 179200  }
   0x2   :  { %3234 = sst [smem:[#allocation3_spill]] %s3163_s2  ;;  %s3194_s2 = smov 124   ;;  %v63_v6 = vand.u32 127, %v62_v2  ;;  %1746 = vset.pattern.permute.xlu1 %v2073_v28  ;;  %1745 = vset.pattern.permute.xlu0 %v2073_v28 }
   0x3   :  { %3235 = sst [smem:[#allocation4_spill]] %s3164_s1  ;;  %s3221_s1 = smov 58   ;;  %1744 = vset.pattern.permute.xlu2 %v2073_v28 }
   0x4   :  { %3236 = sst [smem:[#allocation5_spill]] %s3165_s4  ;;  %s3219_s24 = smov 63   ;;  %v2220_v7 = vand.u32 63, %v63_v6 }
   0x5   :  { %3237 = sst [smem:[#allocation6_spill]] %s3176_s13  ;;  %s3186_s25 = smov 61  }
   0x6   :  { %3238 = sst [smem:[#allocation7_spill]] %s3177_s16  ;;  %s3188_s4 = smov 125   ;;  %vm79_vm0 = vcmp.lt.s32.totalorder %v2220_v7, 60  ;;  %vm80_vm1 = vcmp.lt.s32.totalorder %v2220_v7, 58  ;;  %vm78_vm2 = vcmp.lt.s32.totalorder %v2220_v7, 61  ;;  %vm81_vm6 = vcmp.ge.s32.totalorder %v2220_v7, 1 }
   0x7   :  { %3239 = sst [smem:[#allocation8_spill]] %s3178_s15  ;;  %s3192_s26 = smov 4   ;;  %vm76_vm7 = vcmp.lt.s32.totalorder %v2220_v7, 63  ;;  %vm77_vm8 = vcmp.lt.s32.totalorder %v2220_v7, 62  ;;  %vm3213_vm9 = vcmp.ge.s32.totalorder %v2220_v7, 4  ;;  %vm3214_vm10 = vcmp.ge.s32.totalorder %v2220_v7, 3 }
   0x8   :  { %3240 = sst [smem:[#allocation9_spill]] %s3179_s18  ;;  %s3208_s27 = smov 1   ;;  %vm3212_vm11 = vcmp.ge.s32.totalorder %v2220_v7, 6  ;;  %vm85_vm12 = vcmp.ge.s32.totalorder %v2220_v7, 2 }
   0x9   :  { %3241 = sst [smem:[#allocation10_spill]] %s3180_s17  ;;  %s3190_s28 = smov 68  }
   0xa   :  { %3242 = sst [smem:[#allocation11_spill]] %s3181_s19  ;;  %s3210_s29 = smov 65  }
   0xb   :  { %s3243_s20 = sld [smem:[#allocation2_spill]]  ;;  %s3215_s0 = smov 62  }
   0xc   :  { %s3196_s30 = smov 126   ;;  %s3271_s18 = smov 2  }
   0xd   :  { %s3272_s19 = smov 63  }
  0x11   :  { %v2178_v0 = vld [vmem:[%s3243_s20] sm:$0x3]  ;;  %s3273_s20 = smov 127  }
  0x12   :  { %150 = vrot.lane.b32.xlu1 %v2178_v0, %s3227_s21  ;;  %143 = vrot.lane.b32.xlu0 %v2178_v0, %s3194_s2  ;;  %s3204_s2 = smov 66   ;;  %v167_v23 = vrot.slane %v2178_v0, 6 }
  0x13   :  { %122 = vrot.lane.b32.xlu2 %v2178_v0, %s3223_s22 }
  0x1a   :  { %152 = vrot.lane.b32.xlu1 %v2178_v0, %s3221_s1  ;;  %145 = vrot.lane.b32.xlu0 %v2178_v0, %s3217_s23 }
  0x1b   :  { %124 = vrot.lane.b32.xlu2 %v2178_v0, %s3219_s24 }
  0x22   :  { %138 = vrot.lane.b32.xlu1 %v2178_v0, %s3186_s25  ;;  %136 = vrot.lane.b32.xlu0 %v2178_v0, %s3188_s4  ;;  %s3206_s25 = smov 3   ;;  %s3200_s4 = smov 6  }
  0x23   :  { %94 = vrot.lane.b32.xlu2 %v2178_v0, %s3192_s26  ;;  %s3198_s26 = smov 70  }
  0x2a   :  { %115 = vrot.lane.b32.xlu1 %v2178_v0, %s3208_s27  ;;  %96 = vrot.lane.b32.xlu0 %v2178_v0, %s3190_s28  ;;  %s3202_s28 = smov 67   ;;  %s3249_s27 = smov 3  }
  0x2b   :  { %117 = vrot.lane.b32.xlu2 %v2178_v0, %s3210_s29  ;;  %s3250_s29 = smov 124  }
  0x32   :  { %131 = vrot.lane.b32.xlu1 %v2178_v0, %s3215_s0  ;;  %129 = vrot.lane.b32.xlu0 %v2178_v0, %s3196_s30  ;;  %s3225_s30 = smov 2  }
  0x33   :  { %101 = vrot.lane.b32.xlu2 %v2178_v0, %s3206_s25  ;;  %s3252_s25 = smov 4  }
  0x3a   :  { %87 = vrot.lane.b32.xlu1 %v2178_v0, %s3200_s4  ;;  %103 = vrot.lane.b32.xlu0 %v2178_v0, %s3202_s28  ;;  %s3244_s28 = sld [smem:[#allocation3_spill]]  ;;  %s3254_s4 = smov 126  }
  0x3b   :  { %89 = vrot.lane.b32.xlu2 %v2178_v0, %s3198_s26  ;;  %s3248_s26 = smov 1  }
  0x40   :  { %v195_v26 = vld [vmem:[%s3244_s28] sm:$0xff]  ;;  %v196_v37 = vld [vmem:[%s3244_s28 + $0x8] sm:$0xff]  ;;  %v197_v38 = vld [vmem:[%s3244_s28 + $0x10] sm:$0x3]  ;;  %s3245_s28 = sld [smem:[#allocation4_spill]] }
  0x42   :  { %110 = vrot.lane.b32.xlu1 %v2178_v0, %s3204_s2  ;;  %108 = vrot.lane.b32.xlu0 %v2178_v0, %s3225_s30  ;;  %s3246_s2 = sld [smem:[#allocation5_spill]] }
  0x43   :  { %210 = vperm.xlu2 %1744, %v197_v38  }
  0x46   :  { %v192_v53 = vld [vmem:[%s3245_s28] sm:$0xff]  ;;  %v193_v55 = vld [vmem:[%s3245_s28 + $0x8] sm:$0xff]  ;;  %v194_v56 = vld [vmem:[%s3245_s28 + $0x10] sm:$0x3]  ;;  %s3253_s28 = smov 67  }
  0x48   :  { %v346_v6 = vld [vmem:[%s3246_s2 + $0x8] sm:$0xff] }
  0x4a   :  { %200 = vperm.xlu1 %1746, %v195_v26   ;;  %205 = vperm.xlu0 %1745, %v196_v37  }
  0x6d   :  { %v123_v1 = vpop.permute.xlu2 %122 }
  0x75   :  { %v125_v5 = vpop.permute.xlu2 %124 }
  0x76   :  { %v128_v25 = vsel %vm76_vm7, %v123_v1, %v125_v5 }
  0x77   :  { %v170_v32 = vrot.slane %v128_v25, 4 }
  0x7d   :  { %v95_v10 = vpop.permute.xlu2 %94 }
  0x84   :  { %v151_v3 = vpop.permute.xlu1 %150  ;;  %v144_v4 = vpop.permute.xlu0 %143 }
  0x85   :  { %v118_v20 = vpop.permute.xlu2 %117 }
  0x8c   :  { %v153_v8 = vpop.permute.xlu1 %152  ;;  %v146_v9 = vpop.permute.xlu0 %145 }
  0x8d   :  { %v149_v11 = vsel %vm79_vm0, %v144_v4, %v146_v9  ;;  %v156_v12 = vsel %vm80_vm1, %v151_v3, %v153_v8  ;;  %v102_v27 = vpop.permute.xlu2 %101  ;;  %v345_v8 = vld [vmem:[%s3246_s2] sm:$0xff]  ;;  %v347_v9 = vld [vmem:[%s3246_s2 + $0x10] sm:$0x3]  ;;  %s3251_s2 = smov 66  }
  0x8e   :  { %v176_v13 = vrot.slane %v149_v11, 6  ;;  %v179_v16 = vrot.slane %v156_v12, 4 }
  0x94   :  { %v139_v14 = vpop.permute.xlu1 %138  ;;  %v137_v15 = vpop.permute.xlu0 %136 }
  0x95   :  { %v142_v17 = vsel %vm78_vm2, %v137_v15, %v139_v14  ;;  %v90_v41 = vpop.permute.xlu2 %89 }
  0x96   :  { %v190_v18 = vsel %vm181_vm3, %v142_v17, %v176_v13 }
  0x97   :  { %v191_v19 = vsel %vm183_vm4, %v190_v18, %v179_v16 }
  0x98   :  { %1688 = vmatpush.msk.msra.mxu0 %vm185_vm5, %v191_v19 }
  0x9c   :  { %v116_v21 = vpop.permute.xlu1 %115  ;;  %v97_v22 = vpop.permute.xlu0 %96 }
  0x9d   :  { %v121_v24 = vsel %vm81_vm6, %v116_v21, %v118_v20  ;;  %v100_v42 = vsel %vm3213_vm9, %v95_v10, %v97_v22  ;;  %v211_v1 = vpop.permute.xlu2 %210  ;;  %v2074_v10 = vmov 128.0  }
  0x9e   :  { %v187_v29 = vsel %vm181_vm3, %v121_v24, %v167_v23  ;;  %v158_v45 = vrot.slane %v100_v42, 6  ;;  %2027 = vrcp.f32 %v2074_v10 }
  0x9f   :  { %v188_v35 = vsel %vm183_vm4, %v187_v29, %v170_v32 }
  0xa4   :  { %v132_v30 = vpop.permute.xlu1 %131  ;;  %v130_v31 = vpop.permute.xlu0 %129 }
  0xa5   :  { %v135_v33 = vsel %vm77_vm8, %v130_v31, %v132_v30  ;;  %v2028_v11 = vpop.eup %2027 }
  0xa6   :  { %v173_v34 = vrot.slane %v135_v33, 2  ;;  %v263_v12 = vmul.f32 128.0, %v2028_v11  ;;  %vm267_vm14 = vweird.f32 %v2028_v11 }
  0xa8   :  { %v189_v36 = vsel %vm185_vm5, %v188_v35, %v173_v34  ;;  %v264_v13 = vsub.f32 1.0, %v263_v12 }
  0xa9   :  { %240 = vmatpush.msra.mxu0 %v189_v36 }
  0xaa   :  { %v265_v14 = vmul.f32 %v2028_v11, %v264_v13 }
  0xac   :  { %v88_v39 = vpop.permute.xlu1 %87  ;;  %v104_v40 = vpop.permute.xlu0 %103  ;;  %v266_v15 = vadd.f32 %v2028_v11, %v265_v14 }
  0xad   :  { %v107_v43 = vsel %vm3214_vm10, %v102_v27, %v104_v40  ;;  %v93_v44 = vsel %vm3212_vm11, %v88_v39, %v90_v41 }
  0xae   :  { %v161_v46 = vrot.slane %v107_v43, 4  ;;  %v182_v47 = vsel %vm181_vm3, %v93_v44, %v158_v45  ;;  %v2290_v16 = vsel %vm267_vm14, %v2028_v11, %v266_v15 }
  0xb0   :  { %v184_v52 = vsel %vm183_vm4, %v182_v47, %v161_v46  ;;  %v288_v47 = vld [vmem:[%s3166_s3] sm:$0xff] }
  0xb4   :  { %v111_v48 = vpop.permute.xlu1 %110  ;;  %v109_v49 = vpop.permute.xlu0 %108 }
  0xb5   :  { %v114_v50 = vsel %vm85_vm12, %v109_v49, %v111_v48 }
  0xb6   :  { %v164_v51 = vrot.slane %v114_v50, 2 }
  0xb8   :  { %v186_v54 = vsel %vm185_vm5, %v184_v52, %v164_v51 }
  0xb9   :  { %241 = vmatpush.msra.mxu0 %v186_v54 }
  0xba   :  { %1689 = vmatmul.msk.f32.vlgmr.msra.gmra.mxu0 %vm213_vm13, %v192_v53 }
  0xbc   :  { %v201_v57 = vpop.permute.xlu1 %200  ;;  %v206_v61 = vpop.permute.xlu0 %205 }
  0xc2   :  { %1690 = vmatmul.msk.f32.gmra.mxu0 %vm213_vm13, %v193_v55  ;;  %v289_v55 = vld [vmem:[%s3166_s3 + $0x8] sm:$0xff] }
  0xca   :  { %1691 = vmatmul.msk.f32.gmra.mxu0 %vm213_vm13, %v194_v56 }
 0x137   :  { %v243_v58 = vpop.f32.mrf.mxu0 }
 0x138   :  { %v244_v59 = vadd.f32 %v243_v58, %v201_v57 }
 0x13a   :  { %v252_v60 = vmax.f32 %v244_v59, 0.0 }
 0x13c   :  { %255 = vadd.xlane.f32.xlu0 %v252_v60 }
 0x13f   :  { %v246_v62 = vpop.f32.mrf.mxu0 }
 0x140   :  { %v247_v63 = vadd.f32 %v246_v62, %v206_v61 }
 0x142   :  { %v253_v0 = vmax.f32 %v247_v63, 0.0 }
 0x144   :  { %257 = vadd.xlane.f32.xlu1 %v253_v0 }
 0x147   :  { %v249_v2 = vpop.f32.mrf.mxu0 }
 0x148   :  { %v250_v3 = vadd.f32 %v249_v2, %v211_v1 }
 0x14a   :  { %v254_v4 = vmax.f32 %v250_v3, 0.0 }
 0x14c   :  { %v259_v5 = vsel %vm181_vm3, %v254_v4, 0.0 }
 0x14d   :  { %260 = vadd.xlane.f32.xlu2 %v259_v5 }
 0x150   :  { %355 = vperm.xlu0 %1745, %v346_v6  }
 0x15d   :  { %350 = vperm.xlu1 %1746, %v345_v8  }
 0x165   :  { %360 = vperm.xlu2 %1744, %v347_v9  }
 0x1af   :  { %v256_v17 = vpop.xlane.xlu0 %255 }
 0x1b0   :  { %v269_v18 = vmul.f32 %v2290_v16, %v256_v17 }
 0x1b2   :  { %v2293_v19 = vsub.f32 %v252_v60, %v269_v18 }
 0x1b4   :  { %v275_v20 = vmul.f32 %v2293_v19, %v2293_v19 }
 0x1b6   :  { %278 = vadd.xlane.f32.xlu1 %v275_v20 }
 0x1b7   :  { %v258_v21 = vpop.xlane.xlu1 %257 }
 0x1b8   :  { %v270_v22 = vmul.f32 %v2290_v16, %v258_v21 }
 0x1ba   :  { %v2298_v23 = vsub.f32 %v253_v0, %v270_v22  ;;  %v290_v0 = vld [vmem:[%s3166_s3 + $0x10] sm:$0x3]  ;;  %s3247_s3 = smov 65   ;;  %v618_v22 = vld [vmem:[%s3167_s6 + $0x8] sm:$0xff] }
 0x1bc   :  { %v276_v24 = vmul.f32 %v2298_v23, %v2298_v23 }
 0x1be   :  { %280 = vadd.xlane.f32.xlu2 %v276_v24  ;;  %v617_v24 = vld [vmem:[%s3167_s6] sm:$0xff] }
 0x1c0   :  { %v261_v25 = vpop.xlane.xlu2 %260 }
 0x1c1   :  { %v271_v26 = vmul.f32 %v2290_v16, %v261_v25 }
 0x1c2   :  { %v356_v8 = vpop.permute.xlu0 %355 }
 0x1c3   :  { %v2303_v27 = vsub.f32 %v254_v4, %v271_v26 }
 0x1c5   :  { %v277_v28 = vmul.f32 %v2303_v27, %v2303_v27 }
 0x1c7   :  { %v282_v29 = vsel %vm181_vm3, %v277_v28, 0.0 }
 0x1c8   :  { %283 = vadd.xlane.f32.xlu2 %v282_v29  ;;  %v2308_v31 = vpop.permute.xlu2 %360 }
 0x1cf   :  { %v351_v30 = vpop.permute.xlu1 %350 }
 0x229   :  { %v279_v32 = vpop.xlane.xlu1 %278 }
 0x22a   :  { %v285_v33 = vmul.f32 %v279_v32, %v2290_v16 }
 0x22c   :  { %v291_v34 = vadd.f32 1e-05, %v285_v33 }
 0x22e   :  { %2029 = vrsqrt.f32 %v291_v34  ;;  %vm300_vm13 = vweird.f32 %v291_v34 }
 0x231   :  { %v281_v35 = vpop.xlane.xlu2 %280 }
 0x232   :  { %v286_v36 = vmul.f32 %v281_v35, %v2290_v16 }
 0x234   :  { %v2030_v37 = vpop.eup %2029  ;;  %v292_v38 = vadd.f32 1e-05, %v286_v36 }
 0x235   :  { %v295_v39 = vmul.f32 %v2030_v37, %v291_v34  ;;  %vm301_vm15 = vweird.f32 %v2030_v37 }
 0x236   :  { %2031 = vrsqrt.f32 %v292_v38  ;;  %vm302_vm14 = vmor %vm300_vm13, %vm301_vm15  ;;  %vm310_vm9 = vweird.f32 %v292_v38 }
 0x237   :  { %v296_v40 = vmul.f32 %v2030_v37, %v295_v39 }
 0x239   :  { %v297_v41 = vmul.f32 0.5, %v296_v40 }
 0x23b   :  { %v298_v42 = vsub.f32 1.5, %v297_v41  ;;  %v284_v43 = vpop.xlane.xlu2 %283 }
 0x23c   :  { %v2032_v44 = vpop.eup %2031  ;;  %v287_v45 = vmul.f32 %v284_v43, %v2290_v16 }
 0x23d   :  { %v305_v46 = vmul.f32 %v2032_v44, %v292_v38  ;;  %v299_v48 = vmul.f32 %v2030_v37, %v298_v42  ;;  %vm311_vm11 = vweird.f32 %v2032_v44 }
 0x23e   :  { %v293_v49 = vadd.f32 1e-05, %v287_v45  ;;  %vm312_vm10 = vmor %vm310_vm9, %vm311_vm11  ;;  %vm3262_vm9 = vcmp.ge.s32.totalorder %v2220_v7, 3 }
 0x23f   :  { %v306_v50 = vmul.f32 %v2032_v44, %v305_v46  ;;  %v303_v51 = vsel %vm302_vm14, %v2030_v37, %v299_v48  ;;  %vm3264_vm11 = vmmov %vm3262_vm9 }
 0x240   :  { %2033 = vrsqrt.f32 %v293_v49  ;;  %v324_v52 = vmul.f32 %v303_v51, %v288_v47  ;;  %vm320_vm13 = vweird.f32 %v293_v49 }
 0x241   :  { %v307_v53 = vmul.f32 0.5, %v306_v50 }
 0x242   :  { %329 = vperm.xlu1 %1746, %v324_v52  }
 0x243   :  { %v308_v54 = vsub.f32 1.5, %v307_v53 }
 0x245   :  { %v309_v56 = vmul.f32 %v2032_v44, %v308_v54 }
 0x246   :  { %v2034_v57 = vpop.eup %2033 }
 0x247   :  { %v315_v58 = vmul.f32 %v2034_v57, %v293_v49  ;;  %v313_v59 = vsel %vm312_vm10, %v2032_v44, %v309_v56  ;;  %vm321_vm15 = vweird.f32 %v2034_v57  ;;  %vm3263_vm10 = vmmov %vm3262_vm9 }
 0x248   :  { %v325_v60 = vmul.f32 %v313_v59, %v289_v55  ;;  %vm322_vm14 = vmor %vm320_vm13, %vm321_vm15  ;;  %vm635_vm15 = vcmask 572416   ;;  %vm3265_vm13 = vcmp.ge.s32.totalorder %v2220_v7, 4 }
 0x249   :  { %v316_v61 = vmul.f32 %v2034_v57, %v315_v58 }
 0x24a   :  { %334 = vperm.xlu2 %1744, %v325_v60  }
 0x24b   :  { %v317_v62 = vmul.f32 0.5, %v316_v61 }
 0x24d   :  { %v318_v63 = vsub.f32 1.5, %v317_v62 }
 0x24f   :  { %v319_v1 = vmul.f32 %v2034_v57, %v318_v63 }
 0x251   :  { %v323_v2 = vsel %vm322_vm14, %v2034_v57, %v319_v1  ;;  %vm3266_vm14 = vmmov %vm3265_vm13 }
 0x252   :  { %v326_v3 = vmul.f32 %v323_v2, %v290_v0 }
 0x254   :  { %339 = vperm.xlu0 %1745, %v326_v3  }
 0x2a4   :  { %v335_v9 = vpop.permute.xlu2 %334 }
 0x2a5   :  { %v343_v10 = vmul.f32 %v335_v9, %v2298_v23  ;;  %v619_v23 = vld [vmem:[%s3167_s6 + $0x10] sm:$0xf]  ;;  %s3275_s6 = smov 58  }
 0x2a7   :  { %v2350_v12 = vadd.f32 %v356_v8, %v343_v10 }
 0x2a9   :  { %v553_v2 = vrot.slane %v2350_v12, 6 }
 0x2b4   :  { %v330_v4 = vpop.permute.xlu1 %329 }
 0x2b5   :  { %v342_v5 = vmul.f32 %v330_v4, %v2293_v19 }
 0x2b7   :  { %v2323_v6 = vadd.f32 %v351_v30, %v342_v5 }
 0x2b9   :  { %447 = vrot.lane.b32.xlu1 %v2323_v6, %s3219_s24  ;;  %441 = vrot.lane.b32.xlu2 %v2323_v6, %s3223_s22  ;;  %v1747_v15 = vpack.i.bf16 %v2350_v12, %v2323_v6  ;;  %v552_v5 = vrot.slane %v2323_v6, 6 }
 0x2ba   :  { %462 = vrot.lane.b32.xlu0 %v2323_v6, %s3215_s0  ;;  %s3255_s0 = smov 68  }
 0x2c1   :  { %411 = vrot.lane.b32.xlu1 %v2323_v6, %s3225_s30  ;;  %507 = vrot.lane.b32.xlu2 %v2323_v6, %s3221_s1 }
 0x2c2   :  { %501 = vrot.lane.b32.xlu0 %v2323_v6, %s3227_s21 }
 0x2c6   :  { %v340_v11 = vpop.permute.xlu0 %339 }
 0x2c7   :  { %v344_v13 = vmul.f32 %v340_v11, %v2303_v27 }
 0x2c9   :  { %492 = vrot.lane.b32.xlu1 %v2323_v6, %s3217_s23  ;;  %432 = vrot.lane.b32.xlu2 %v2323_v6, %s3247_s3  ;;  %v2360_v14 = vadd.f32 %v2308_v31, %v344_v13  ;;  %s3256_s23 = smov 125  }
 0x2ca   :  { %426 = vrot.lane.b32.xlu0 %v2323_v6, %s3248_s26 }
 0x2cb   :  { %v1757_v17 = vpack.i.bf16 %v2360_v14, %v2350_v12  ;;  %v1767_v18 = vpack.i.bf16 %v2350_v12, %v2360_v14  ;;  %v555_v61 = vrot.slane %v2360_v14, 6 }
 0x2cd   :  { %v556_v9 = vsel %vm181_vm3, %v553_v2, %v555_v61 }
 0x2d1   :  { %396 = vrot.lane.b32.xlu1 %v2323_v6, %s3249_s27  ;;  %486 = vrot.lane.b32.xlu2 %v2323_v6, %s3250_s29 }
 0x2d2   :  { %417 = vrot.lane.b32.xlu0 %v2323_v6, %s3251_s2 }
 0x2d9   :  { %381 = vrot.lane.b32.xlu1 %v2323_v6, %s3252_s25  ;;  %509 = vrot.lane.b32.xlu2 %v2350_v12, %s3221_s1 }
 0x2da   :  { %402 = vrot.lane.b32.xlu0 %v2323_v6, %s3253_s28 }
 0x2e1   :  { %1748 = vrot.lane.b32.xlu1 %v1747_v15, %s3254_s4  ;;  %1758 = vrot.lane.b32.xlu2 %v1757_v17, %s3219_s24  ;;  %s3257_s24 = smov 61  }
 0x2e2   :  { %387 = vrot.lane.b32.xlu0 %v2323_v6, %s3255_s0 }
 0x2e9   :  { %503 = vrot.lane.b32.xlu1 %v2350_v12, %s3227_s21  ;;  %1768 = vrot.lane.b32.xlu2 %v1767_v18, %s3247_s3 }
 0x2ea   :  { %471 = vrot.lane.b32.xlu0 %v2323_v6, %s3256_s23 }
 0x2f1   :  { %511 = vrot.lane.b32.xlu1 %v2360_v14, %s3221_s1  ;;  %1783 = vrot.lane.b32.xlu2 %v1757_v17, %s3225_s30  ;;  %s3258_s1 = smov 60   ;;  %s3260_s30 = smov 6  }
 0x2f2   :  { %1753 = vrot.lane.b32.xlu0 %v1757_v17, %s3223_s22  ;;  %s3259_s22 = smov 62  }
 0x2f9   :  { %1773 = vrot.lane.b32.xlu1 %v1757_v17, %s3250_s29  ;;  %1798 = vrot.lane.b32.xlu2 %v1757_v17, %s3253_s28 }
 0x2fa   :  { %1763 = vrot.lane.b32.xlu0 %v1767_v18, %s3248_s26 }
 0x301   :  { %1788 = vrot.lane.b32.xlu1 %v1757_v17, %s3251_s2  ;;  %1803 = vrot.lane.b32.xlu2 %v1767_v18, %s3256_s23 }
 0x302   :  { %505 = vrot.lane.b32.xlu0 %v2360_v14, %s3227_s21  ;;  %s3261_s21 = smov 70  }
 0x309   :  { %1808 = vrot.lane.b32.xlu1 %v1767_v18, %s3257_s24  ;;  %1818 = vrot.lane.b32.xlu2 %v1757_v17, %s3255_s0 }
 0x30a   :  { %1778 = vrot.lane.b32.xlu0 %v1757_v17, %s3258_s1 }
 0x311   :  { %1823 = vrot.lane.b32.xlu1 %v1757_v17, %s3259_s22  ;;  %460 = vrot.lane.b32.xlu2 %v2360_v14, %s3254_s4  ;;  %v554_v14 = vsel %vm181_vm3, %v552_v5, %v553_v2 }
 0x312   :  { %1793 = vrot.lane.b32.xlu0 %v1757_v17, %s3249_s27 }
 0x313   :  { %v442_v19 = vpop.permute.xlu2 %441 }
 0x319   :  { %1828 = vrot.lane.b32.xlu1 %v1767_v18, %s3260_s30  ;;  %477 = vrot.lane.b32.xlu2 %v2323_v6, %s3257_s24 }
 0x31a   :  { %1813 = vrot.lane.b32.xlu0 %v1757_v17, %s3252_s25 }
 0x31b   :  { %v2399_v20 = vpop.permute.xlu2 %507 }
 0x321   :  { %372 = vrot.lane.b32.xlu1 %v2323_v6, %s3261_s21  ;;  %366 = vrot.lane.b32.xlu2 %v2323_v6, %s3260_s30 }
 0x322   :  { %1833 = vrot.lane.b32.xlu0 %v1767_v18, %s3261_s21 }
 0x323   :  { %v2406_v21 = vpop.permute.xlu2 %432 }
 0x329   :  { %627 = vperm.xlu1 %1746, %v618_v22   ;;  %632 = vperm.xlu2 %1744, %v619_v23  }
 0x32a   :  { %622 = vperm.xlu0 %1745, %v617_v24  }
 0x32b   :  { %v448_v25 = vpop.permute.xlu1 %447  ;;  %v2417_v27 = vpop.permute.xlu2 %486 }
 0x32c   :  { %v463_v26 = vpop.permute.xlu0 %462  ;;  %v453_v55 = vsel %vm76_vm7, %v442_v19, %v448_v25 }
 0x32d   :  { %v563_v62 = vrot.slane %v453_v55, 4 }
 0x32f   :  { %v607_v10 = vsel %vm183_vm4, %v556_v9, %v563_v62 }
 0x333   :  { %v2419_v28 = vpop.permute.xlu1 %411  ;;  %v510_v30 = vpop.permute.xlu2 %509 }
 0x334   :  { %v2421_v29 = vpop.permute.xlu0 %501 }
 0x33b   :  { %v2423_v31 = vpop.permute.xlu1 %492  ;;  %v1759_v33 = vpop.permute.xlu2 %1758 }
 0x33c   :  { %v2425_v32 = vpop.permute.xlu0 %426  ;;  %v1761_v48 = vunpack.i.h.bf16 %v1759_v33  ;;  %v1760_v49 = vunpack.i.l.bf16 %v1759_v33 }
 0x343   :  { %v2427_v34 = vpop.permute.xlu1 %396  ;;  %v1769_v37 = vpop.permute.xlu2 %1768 }
 0x344   :  { %v418_v35 = vpop.permute.xlu0 %417  ;;  %v1770_v8 = vunpack.i.l.bf16 %v1769_v37  ;;  %v1771_v12 = vunpack.i.h.bf16 %v1769_v37 }
 0x34b   :  { %v2429_v36 = vpop.permute.xlu1 %381  ;;  %v1784_v41 = vpop.permute.xlu2 %1783 }
 0x34c   :  { %v2431_v38 = vpop.permute.xlu0 %402  ;;  %v1786_v18 = vunpack.i.h.bf16 %v1784_v41  ;;  %v1785_v19 = vunpack.i.l.bf16 %v1784_v41 }
 0x353   :  { %v2433_v39 = vpop.permute.xlu1 %1748  ;;  %v2439_v44 = vpop.permute.xlu2 %1798 }
 0x354   :  { %v2435_v40 = vpop.permute.xlu0 %387  ;;  %v1750_v45 = vunpack.i.l.bf16 %v2433_v39 }
 0x356   :  { %v2444_v52 = vsel %vm77_vm8, %v1750_v45, %v463_v26  ;;  %v513_v26 = vsel %vm80_vm1, %v2421_v29, %v2399_v20 }
 0x357   :  { %v574_v58 = vrot.slane %v2444_v52, 2 }
 0x35b   :  { %v504_v42 = vpop.permute.xlu1 %503  ;;  %v2453_v59 = vpop.permute.xlu2 %1803 }
 0x35c   :  { %v2437_v43 = vpop.permute.xlu0 %471  ;;  %v514_v15 = vsel %vm80_vm1, %v504_v42, %v510_v30  ;;  %v2480_v30 = vsel %vm85_vm12, %v2419_v28, %v418_v35  ;;  %v438_v28 = vsel %vm81_vm6, %v2425_v32, %v2406_v21 }
 0x35d   :  { %v597_v41 = vrot.slane %v514_v15, 4 }
 0x363   :  { %v512_v46 = vpop.permute.xlu1 %511  ;;  %v2471_v22 = vpop.permute.xlu2 %1818 }
 0x364   :  { %v1754_v47 = vpop.permute.xlu0 %1753 }
 0x365   :  { %v1756_v50 = vunpack.i.h.bf16 %v1754_v47  ;;  %v1755_v51 = vunpack.i.l.bf16 %v1754_v47 }
 0x367   :  { %v454_v53 = vsel %vm76_vm7, %v1755_v51, %v1760_v49  ;;  %v455_v54 = vsel %vm76_vm7, %v1756_v50, %v1761_v48  ;;  %v541_v48 = vrot.slane %v2480_v30, 2 }
 0x368   :  { %v564_v56 = vrot.slane %v454_v53, 4  ;;  %v566_v57 = vrot.slane %v455_v54, 4 }
 0x36a   :  { %v567_v60 = vsel %vm183_vm4, %v564_v56, %v566_v57  ;;  %v565_v4 = vsel %vm183_vm4, %v563_v62, %v564_v56  ;;  %v498_v62 = vsel %vm79_vm0, %v2417_v27, %v2423_v31 }
 0x36b   :  { %v1774_v63 = vpop.permute.xlu1 %1773  ;;  %v608_v0 = vsel %vm185_vm5, %v567_v60, %v574_v58  ;;  %v461_v57 = vpop.permute.xlu2 %460 }
 0x36c   :  { %v1764_v1 = vpop.permute.xlu0 %1763  ;;  %647 = vmatpush.msra.mxu1 %v608_v0  ;;  %v1776_v32 = vunpack.i.h.bf16 %v1774_v63  ;;  %v1775_v54 = vunpack.i.l.bf16 %v1774_v63 }
 0x36d   :  { %v1765_v3 = vunpack.i.l.bf16 %v1764_v1  ;;  %v1766_v13 = vunpack.i.h.bf16 %v1764_v1 }
 0x36e   :  { %648 = vmatpush.msra.mxu1 %v565_v4  ;;  %v585_v4 = vrot.slane %v498_v62, 6 }
 0x36f   :  { %v440_v11 = vsel %vm81_vm6, %v1765_v3, %v1770_v8  ;;  %v439_v37 = vsel %vm81_vm6, %v1766_v13, %v1771_v12  ;;  %v1805_v3 = vunpack.i.l.bf16 %v2453_v59  ;;  %v1801_v8 = vunpack.i.h.bf16 %v2439_v44 }
 0x370   :  { %649 = vmatpush.msra.mxu1 %v607_v10  ;;  %v606_v6 = vsel %vm181_vm3, %v440_v11, %v552_v5  ;;  %v1751_v5 = vunpack.i.h.bf16 %v2433_v39  ;;  %v1800_v11 = vunpack.i.l.bf16 %v2439_v44  ;;  %v1806_v44 = vunpack.i.h.bf16 %v2453_v59 }
 0x372   :  { %650 = vmatpush.msra.mxu1 %v554_v14 }
 0x373   :  { %v1789_v17 = vpop.permute.xlu1 %1788 }
 0x374   :  { %v1791_v23 = vunpack.i.h.bf16 %v1789_v17  ;;  %v1790_v24 = vunpack.i.l.bf16 %v1789_v17  ;;  %v506_v25 = vpop.permute.xlu0 %505  ;;  %651 = vmatpush.msra.mxu1 %v606_v6 }
 0x375   :  { %v515_v33 = vsel %vm80_vm1, %v506_v25, %v512_v46  ;;  %v596_v46 = vrot.slane %v513_v26, 4  ;;  %v408_v25 = vsel %vm3264_vm11, %v2427_v34, %v2431_v38  ;;  %v478_v26 = vpop.permute.xlu2 %477  ;;  %v1821_v34 = vunpack.i.h.bf16 %v2471_v22 }
 0x376   :  { %v599_v42 = vrot.slane %v515_v33, 4  ;;  %652 = vmatpush.msra.mxu1 %v439_v37  ;;  %v424_v45 = vsel %vm85_vm12, %v1785_v19, %v1790_v24  ;;  %v425_v20 = vsel %vm85_vm12, %v1786_v18, %v1791_v23  ;;  %v1820_v38 = vunpack.i.l.bf16 %v2471_v22 }
 0x377   :  { %v542_v29 = vrot.slane %v424_v45, 2  ;;  %v544_v35 = vrot.slane %v425_v20, 2  ;;  %v598_v50 = vsel %vm183_vm4, %v596_v46, %v597_v41  ;;  %v530_v45 = vrot.slane %v408_v25, 4 }
 0x378   :  { %653 = vmatpush.msra.mxu1 %v438_v28  ;;  %v600_v47 = vsel %vm183_vm4, %v597_v41, %v599_v42  ;;  %v483_v28 = vsel %vm78_vm2, %v2437_v43, %v478_v26 }
 0x379   :  { %1692 = vmatpush.msk.msra.mxu2 %vm185_vm5, %v600_v47  ;;  %v545_v49 = vsel %vm185_vm5, %v542_v29, %v544_v35  ;;  %v543_v53 = vsel %vm185_vm5, %v541_v48, %v542_v29 }
 0x37a   :  { %654 = vmatpush.msra.mxu1 %v545_v49 }
 0x37b   :  { %681 = vmatpush.msra.mxu2 %v598_v50  ;;  %v1809_v51 = vpop.permute.xlu1 %1808 }
 0x37c   :  { %v1779_v21 = vpop.permute.xlu0 %1778  ;;  %655 = vmatpush.msra.mxu1 %v543_v53  ;;  %v1810_v0 = vunpack.i.l.bf16 %v1809_v51  ;;  %v1811_v12 = vunpack.i.h.bf16 %v1809_v51 }
 0x37d   :  { %v1781_v55 = vunpack.i.h.bf16 %v1779_v21  ;;  %v1780_v56 = vunpack.i.l.bf16 %v1779_v21 }
 0x37e   :  { %v485_v31 = vsel %vm78_vm2, %v1805_v3, %v1810_v0  ;;  %v484_v59 = vsel %vm78_vm2, %v1806_v44, %v1811_v12  ;;  %v367_v3 = vpop.permute.xlu2 %366 }
 0x37f   :  { %v499_v60 = vsel %vm79_vm0, %v1775_v54, %v1780_v56  ;;  %v500_v61 = vsel %vm79_vm0, %v1776_v32, %v1781_v55  ;;  %v609_v24 = vsel %vm181_vm3, %v485_v31, %v585_v4 }
 0x380   :  { %v586_v1 = vrot.slane %v499_v60, 6  ;;  %v588_v2 = vrot.slane %v500_v61, 6 }
 0x382   :  { %v589_v63 = vsel %vm181_vm3, %v586_v1, %v588_v2  ;;  %v587_v6 = vsel %vm181_vm3, %v585_v4, %v586_v1 }
 0x383   :  { %v1824_v9 = vpop.permute.xlu1 %1823  ;;  %v610_v10 = vsel %vm183_vm4, %v589_v63, %v596_v46  ;;  %v611_v63 = vld [vmem:[%s3168_s5] sm:$0xff] }
 0x384   :  { %v1826_v13 = vunpack.i.h.bf16 %v1824_v9  ;;  %v1825_v14 = vunpack.i.l.bf16 %v1824_v9  ;;  %v1794_v27 = vpop.permute.xlu0 %1793  ;;  %682 = vmatpush.msra.mxu2 %v610_v10  ;;  %v615_v9 = vld [vmem:[%s3168_s5 + $0x20] sm:$0xf] }
 0x385   :  { %v1796_v15 = vunpack.i.h.bf16 %v1794_v27  ;;  %v1795_v17 = vunpack.i.l.bf16 %v1794_v27 }
 0x386   :  { %683 = vmatpush.msra.mxu2 %v587_v6  ;;  %v469_v39 = vsel %vm77_vm8, %v1751_v5, %v1825_v14  ;;  %v470_v18 = vsel %vm77_vm8, %v461_v57, %v1826_v13  ;;  %v616_v5 = vld [vmem:[%s3168_s5 + $0x28] sm:$0xf]  ;;  %v633_v44 = vpop.permute.xlu2 %632 }
 0x387   :  { %v410_v19 = vsel %vm3262_vm9, %v1796_v15, %v1801_v8  ;;  %v409_v23 = vsel %vm3263_vm10, %v1795_v17, %v1800_v11  ;;  %v575_v37 = vrot.slane %v469_v39, 2  ;;  %v577_v41 = vrot.slane %v470_v18, 2  ;;  %vm3267_vm9 = vmmov %vm3265_vm13  ;;  %v613_v8 = vld [vmem:[%s3168_s5 + $0x10] sm:$0xff] }
 0x388   :  { %v533_v30 = vrot.slane %v410_v19, 4  ;;  %v531_v33 = vrot.slane %v409_v23, 4  ;;  %684 = vmatpush.msra.mxu2 %v609_v24  ;;  %v393_v53 = vsel %vm3267_vm9, %v2429_v36, %v2435_v40  ;;  %v614_v36 = vld [vmem:[%s3168_s5 + $0x18] sm:$0xff] }
 0x389   :  { %v578_v49 = vsel %vm185_vm5, %v575_v37, %v577_v41  ;;  %v576_v51 = vsel %vm185_vm5, %v574_v58, %v575_v37  ;;  %v519_v55 = vrot.slane %v393_v53, 6  ;;  %v785_v37 = vld [vmem:[%s3169_s8] sm:$0xff] }
 0x38a   :  { %685 = vmatpush.msra.mxu2 %v484_v59  ;;  %v534_v42 = vsel %vm183_vm4, %v531_v33, %v533_v30  ;;  %v532_v47 = vsel %vm183_vm4, %v530_v45, %v531_v33  ;;  %v787_v33 = vld [vmem:[%s3169_s8 + $0x10] sm:$0xf]  ;;  %v786_v59 = vld [vmem:[%s3169_s8 + $0x8] sm:$0xff]  ;;  %s3295_s8 = sld [smem:[#allocation7_spill]] }
 0x38b   :  { %v605_v20 = vsel %vm185_vm5, %v534_v42, %v541_v48  ;;  %v612_v48 = vld [vmem:[%s3168_s5 + $0x8] sm:$0xff]  ;;  %v1829_v43 = vpop.permute.xlu1 %1828  ;;  %vm3268_vm5 = vcmp.ge.s32.totalorder %v2220_v7, 6 }
 0x38c   :  { %v1814_v29 = vpop.permute.xlu0 %1813  ;;  %656 = vmatpush.msra.mxu1 %v605_v20  ;;  %686 = vmatpush.msra.mxu2 %v483_v28  ;;  %v1830_v52 = vunpack.i.l.bf16 %v1829_v43  ;;  %v1831_v62 = vunpack.i.h.bf16 %v1829_v43  ;;  %vm3269_vm10 = vmmov %vm3268_vm5 }
 0x38d   :  { %v1816_v35 = vunpack.i.h.bf16 %v1814_v29  ;;  %v1815_v46 = vunpack.i.l.bf16 %v1814_v29  ;;  %vm3270_vm11 = vmmov %vm3268_vm5 }
 0x38e   :  { %657 = vmatpush.msra.mxu1 %v532_v47  ;;  %687 = vmatpush.msra.mxu2 %v578_v49 }
 0x38f   :  { %v395_v22 = vsel %vm3265_vm13, %v1816_v35, %v1821_v34  ;;  %v394_v50 = vsel %vm3266_vm14, %v1815_v46, %v1820_v38 }
 0x390   :  { %v522_v21 = vrot.slane %v395_v22, 6  ;;  %v520_v32 = vrot.slane %v394_v50, 6  ;;  %688 = vmatpush.msra.mxu2 %v576_v51 }
 0x391   :  { %1693 = vmatmul.msk.f32.vlgmr.msra.gmra.mxu2 %vm635_vm15, %v612_v48 }
 0x392   :  { %v523_v54 = vsel %vm181_vm3, %v520_v32, %v522_v21  ;;  %v521_v58 = vsel %vm181_vm3, %v519_v55, %v520_v32 }
 0x393   :  { %v604_v56 = vsel %vm183_vm4, %v523_v54, %v530_v45  ;;  %v373_v1 = vpop.permute.xlu1 %372 }
 0x394   :  { %v1834_v57 = vpop.permute.xlu0 %1833  ;;  %658 = vmatpush.msra.mxu1 %v604_v56  ;;  %v378_v4 = vsel %vm3270_vm11, %v367_v3, %v373_v1 }
 0x395   :  { %v1835_v60 = vunpack.i.l.bf16 %v1834_v57  ;;  %v1836_v61 = vunpack.i.h.bf16 %v1834_v57 }
 0x396   :  { %659 = vmatpush.msra.mxu1 %v521_v58 }
 0x397   :  { %v380_v40 = vsel %vm3268_vm5, %v1830_v52, %v1835_v60  ;;  %v379_v2 = vsel %vm3269_vm10, %v1831_v62, %v1836_v61 }
 0x398   :  { %v603_v0 = vsel %vm181_vm3, %v380_v40, %v519_v55 }
 0x399   :  { %660 = vmatpush.msra.mxu1 %v603_v0  ;;  %1694 = vmatmul.msk.f32.gmra.mxu2 %vm635_vm15, %v614_v36  ;;  %v728_v0 = vld [vmem:[%s3170_s7] sm:$0xff] }
 0x39b   :  { %661 = vmatpush.msra.mxu1 %v379_v2  ;;  %v628_v15 = vpop.permute.xlu1 %627 }
 0x39c   :  { %v623_v11 = vpop.permute.xlu0 %622 }
 0x39d   :  { %662 = vmatpush.msra.mxu1 %v378_v4 }
 0x39e   :  { %663 = vmatmul.f32.vlgmr.msra.gmra.mxu1 %v611_v63 }
 0x3a1   :  { %1695 = vmatmul.msk.f32.gmra.mxu2 %vm635_vm15, %v616_v5 }
 0x3a6   :  { %666 = vmatmul.f32.gmra.mxu1 %v613_v8 }
 0x3ae   :  { %669 = vmatmul.f32.gmra.mxu1 %v615_v9  ;;  %v729_v9 = vld [vmem:[%s3170_s7 + $0x8] sm:$0xff] }
 0x414   :  { %v690_v10 = vpop.f32.mrf.mxu2 }
 0x41b   :  { %v664_v13 = vpop.f32.mrf.mxu1 }
 0x41c   :  { %v665_v14 = vadd.f32 %v664_v13, %v623_v11  ;;  %v693_v12 = vpop.f32.mrf.mxu2 }
 0x41e   :  { %v691_v27 = vadd.f32 %v690_v10, %v665_v14 }
 0x420   :  { %v699_v31 = vmax.f32 %v691_v27, 0.0 }
 0x422   :  { %702 = vadd.xlane.f32.xlu0 %v699_v31 }
 0x423   :  { %v667_v17 = vpop.f32.mrf.mxu1 }
 0x424   :  { %v668_v6 = vadd.f32 %v667_v17, %v628_v15  ;;  %v696_v23 = vpop.f32.mrf.mxu2  ;;  %v730_v17 = vld [vmem:[%s3170_s7 + $0x10] sm:$0xf]  ;;  %s3274_s7 = smov 122  }
 0x426   :  { %v694_v39 = vadd.f32 %v693_v12, %v668_v6 }
 0x428   :  { %v700_v18 = vmax.f32 %v694_v39, 0.0 }
 0x42a   :  { %704 = vadd.xlane.f32.xlu1 %v700_v18 }
 0x42b   :  { %v670_v19 = vpop.f32.mrf.mxu1 }
 0x42c   :  { %v671_v24 = vadd.f32 %v670_v19, %v633_v44 }
 0x42e   :  { %v697_v25 = vadd.f32 %v696_v23, %v671_v24 }
 0x430   :  { %v701_v26 = vmax.f32 %v697_v25, 0.0 }
 0x432   :  { %v706_v30 = vsel %vm183_vm4, %v701_v26, 0.0 }
 0x433   :  { %707 = vadd.xlane.f32.xlu2 %v706_v30 }
 0x436   :  { %800 = vperm.xlu0 %1745, %v787_v33  }
 0x43e   :  { %795 = vperm.xlu0 %1745, %v786_v59  }
 0x44b   :  { %790 = vperm.xlu2 %1744, %v785_v37  }
 0x495   :  { %v703_v41 = vpop.xlane.xlu0 %702 }
 0x496   :  { %v709_v42 = vmul.f32 %v703_v41, %v2290_v16 }
 0x498   :  { %v2595_v45 = vsub.f32 %v699_v31, %v709_v42 }
 0x49a   :  { %v715_v20 = vmul.f32 %v2595_v45, %v2595_v45 }
 0x49c   :  { %718 = vadd.xlane.f32.xlu0 %v715_v20  ;;  %v1022_v20 = vld [vmem:[%s3171_s10] sm:$0xff] }
 0x49d   :  { %v705_v28 = vpop.xlane.xlu1 %704 }
 0x49e   :  { %v710_v34 = vmul.f32 %v705_v28, %v2290_v16 }
 0x4a0   :  { %v2600_v38 = vsub.f32 %v700_v18, %v710_v34  ;;  %v1023_v34 = vld [vmem:[%s3171_s10 + $0x8] sm:$0xff] }
 0x4a2   :  { %v716_v29 = vmul.f32 %v2600_v38, %v2600_v38 }
 0x4a4   :  { %720 = vadd.xlane.f32.xlu1 %v716_v29 }
 0x4a6   :  { %v708_v35 = vpop.xlane.xlu2 %707 }
 0x4a7   :  { %v711_v46 = vmul.f32 %v708_v35, %v2290_v16 }
 0x4a8   :  { %v2610_v43 = vpop.permute.xlu0 %800 }
 0x4a9   :  { %v2605_v47 = vsub.f32 %v701_v26, %v711_v46 }
 0x4ab   :  { %v717_v49 = vmul.f32 %v2605_v47, %v2605_v47 }
 0x4ad   :  { %v722_v48 = vsel %vm183_vm4, %v717_v49, 0.0 }
 0x4ae   :  { %723 = vadd.xlane.f32.xlu2 %v722_v48  ;;  %v791_v54 = vpop.permute.xlu2 %790 }
 0x4b0   :  { %v2612_v22 = vpop.permute.xlu0 %795 }
 0x50f   :  { %v719_v50 = vpop.xlane.xlu0 %718 }
 0x510   :  { %v725_v51 = vmul.f32 %v719_v50, %v2290_v16 }
 0x512   :  { %v731_v53 = vadd.f32 1e-05, %v725_v51 }
 0x514   :  { %2035 = vrsqrt.f32 %v731_v53  ;;  %vm740_vm15 = vweird.f32 %v731_v53 }
 0x517   :  { %v721_v21 = vpop.xlane.xlu1 %720 }
 0x518   :  { %v726_v32 = vmul.f32 %v721_v21, %v2290_v16 }
 0x51a   :  { %v2036_v55 = vpop.eup %2035  ;;  %v732_v56 = vadd.f32 1e-05, %v726_v32 }
 0x51b   :  { %v735_v57 = vmul.f32 %v2036_v55, %v731_v53  ;;  %vm741_vm3 = vweird.f32 %v2036_v55 }
 0x51c   :  { %2037 = vrsqrt.f32 %v732_v56  ;;  %vm742_vm13 = vmor %vm740_vm15, %vm741_vm3  ;;  %vm750_vm9 = vweird.f32 %v732_v56  ;;  %vm3276_vm15 = vcmp.ge.s32.totalorder %v2220_v7, 3 }
 0x51d   :  { %v736_v52 = vmul.f32 %v2036_v55, %v735_v57 }
 0x51f   :  { %v737_v60 = vmul.f32 0.5, %v736_v52 }
 0x521   :  { %v738_v58 = vsub.f32 1.5, %v737_v60  ;;  %v724_v61 = vpop.xlane.xlu2 %723 }
 0x522   :  { %v2038_v36 = vpop.eup %2037  ;;  %v727_v40 = vmul.f32 %v724_v61, %v2290_v16 }
 0x523   :  { %v745_v62 = vmul.f32 %v2038_v36, %v732_v56  ;;  %v739_v1 = vmul.f32 %v2036_v55, %v738_v58  ;;  %vm751_vm14 = vweird.f32 %v2038_v36 }
 0x524   :  { %v733_v2 = vadd.f32 1e-05, %v727_v40  ;;  %vm752_vm5 = vmor %vm750_vm9, %vm751_vm14 }
 0x525   :  { %v746_v3 = vmul.f32 %v2038_v36, %v745_v62  ;;  %v743_v63 = vsel %vm742_vm13, %v2036_v55, %v739_v1  ;;  %vm3277_vm13 = vcmp.ge.s32.totalorder %v2220_v7, 4 }
 0x526   :  { %2039 = vrsqrt.f32 %v733_v2  ;;  %v764_v4 = vmul.f32 %v743_v63, %v728_v0  ;;  %vm760_vm11 = vweird.f32 %v733_v2  ;;  %vm3278_vm14 = vmmov %vm3277_vm13 }
 0x527   :  { %v747_v5 = vmul.f32 0.5, %v746_v3  ;;  %vm3279_vm9 = vmmov %vm3277_vm13 }
 0x528   :  { %769 = vperm.xlu0 %1745, %v764_v4  }
 0x529   :  { %v748_v8 = vsub.f32 1.5, %v747_v5 }
 0x52b   :  { %v749_v10 = vmul.f32 %v2038_v36, %v748_v8 }
 0x52c   :  { %v2040_v11 = vpop.eup %2039 }
 0x52d   :  { %v755_v13 = vmul.f32 %v2040_v11, %v733_v2  ;;  %v753_v14 = vsel %vm752_vm5, %v2038_v36, %v749_v10  ;;  %vm761_vm10 = vweird.f32 %v2040_v11  ;;  %vm3280_vm5 = vmmov %vm3276_vm15 }
 0x52e   :  { %v765_v27 = vmul.f32 %v753_v14, %v729_v9  ;;  %vm762_vm3 = vmor %vm760_vm11, %vm761_vm10  ;;  %vm3282_vm11 = vcmp.ge.s32.totalorder %v2220_v7, 6 }
 0x52f   :  { %v756_v31 = vmul.f32 %v2040_v11, %v755_v13  ;;  %vm3281_vm10 = vmmov %vm3280_vm5 }
 0x530   :  { %774 = vperm.xlu2 %1744, %v765_v27  }
 0x531   :  { %v757_v12 = vmul.f32 0.5, %v756_v31 }
 0x533   :  { %v758_v15 = vsub.f32 1.5, %v757_v12 }
 0x535   :  { %v759_v6 = vmul.f32 %v2040_v11, %v758_v15 }
 0x537   :  { %v763_v39 = vsel %vm762_vm3, %v2040_v11, %v759_v6  ;;  %vm3283_vm3 = vmmov %vm3282_vm11 }
 0x538   :  { %v766_v18 = vmul.f32 %v763_v39, %v730_v17 }
 0x53a   :  { %779 = vperm.xlu1 %1746, %v766_v18  }
 0x58a   :  { %v775_v24 = vpop.permute.xlu2 %774 }
 0x58b   :  { %v783_v25 = vmul.f32 %v775_v24, %v2600_v38  ;;  %v1024_v38 = vld [vmem:[%s3171_s10 + $0x10] sm:$0xf] }
 0x58d   :  { %v804_v30 = vadd.f32 %v2612_v22, %v783_v25 }
 0x58f   :  { %v982_v48 = vrot.slane %v804_v30, 4 }
 0x59a   :  { %v770_v44 = vpop.permute.xlu0 %769 }
 0x59b   :  { %v782_v19 = vmul.f32 %v770_v44, %v2595_v45 }
 0x59d   :  { %v2627_v23 = vadd.f32 %v791_v54, %v782_v19 }
 0x59f   :  { %851 = vrot.lane.b32.xlu0 %v2627_v23, %s3271_s18  ;;  %887 = vrot.lane.b32.xlu2 %v2627_v23, %s3272_s19  ;;  %v1837_v59 = vpack.i.bf16 %v2627_v23, %v804_v30 }
 0x5a0   :  { %881 = vrot.lane.b32.xlu1 %v2627_v23, %s3273_s20 }
 0x5a7   :  { %836 = vrot.lane.b32.xlu0 %v2627_v23, %s3249_s27  ;;  %872 = vrot.lane.b32.xlu2 %v2627_v23, %s3247_s3 }
 0x5a8   :  { %866 = vrot.lane.b32.xlu1 %v2627_v23, %s3248_s26 }
 0x5ac   :  { %v780_v26 = vpop.permute.xlu1 %779 }
 0x5ad   :  { %v784_v33 = vmul.f32 %v780_v26, %v2605_v47 }
 0x5af   :  { %827 = vrot.lane.b32.xlu0 %v2627_v23, %s3255_s0  ;;  %821 = vrot.lane.b32.xlu2 %v2627_v23, %s3252_s25  ;;  %v805_v37 = vadd.f32 %v2610_v43, %v784_v33  ;;  %v981_v43 = vrot.slane %v2627_v23, 4 }
 0x5b0   :  { %857 = vrot.lane.b32.xlu1 %v2627_v23, %s3251_s2 }
 0x5b1   :  { %v1847_v41 = vpack.i.bf16 %v804_v30, %v805_v37  ;;  %v1857_v42 = vpack.i.bf16 %v805_v37, %v804_v30  ;;  %v984_v46 = vrot.slane %v805_v37, 4  ;;  %v983_v50 = vsel %vm183_vm4, %v981_v43, %v982_v48 }
 0x5b3   :  { %v985_v22 = vsel %vm183_vm4, %v982_v48, %v984_v46 }
 0x5b7   :  { %806 = vrot.lane.b32.xlu0 %v2627_v23, %s3260_s30  ;;  %932 = vrot.lane.b32.xlu2 %v2627_v23, %s3258_s1 }
 0x5b8   :  { %842 = vrot.lane.b32.xlu1 %v2627_v23, %s3253_s28 }
 0x5bf   :  { %1838 = vrot.lane.b32.xlu0 %v1837_v59, %s3274_s7  ;;  %911 = vrot.lane.b32.xlu2 %v2627_v23, %s3256_s23 }
 0x5c0   :  { %926 = vrot.lane.b32.xlu1 %v2627_v23, %s3250_s29 }
 0x5c7   :  { %1848 = vrot.lane.b32.xlu0 %v1847_v41, %s3248_s26  ;;  %1858 = vrot.lane.b32.xlu2 %v1857_v42, %s3271_s18 }
 0x5c8   :  { %812 = vrot.lane.b32.xlu1 %v2627_v23, %s3261_s21 }
 0x5cf   :  { %1863 = vrot.lane.b32.xlu0 %v1857_v42, %s3251_s2  ;;  %1868 = vrot.lane.b32.xlu2 %v1847_v41, %s3249_s27 }
 0x5d0   :  { %1843 = vrot.lane.b32.xlu1 %v1837_v59, %s3275_s6 }
 0x5d7   :  { %1873 = vrot.lane.b32.xlu0 %v1847_v41, %s3253_s28  ;;  %951 = vrot.lane.b32.xlu2 %v805_v37, %s3275_s6 }
 0x5d8   :  { %1853 = vrot.lane.b32.xlu1 %v1847_v41, %s3247_s3 }
 0x5df   :  { %1883 = vrot.lane.b32.xlu0 %v1857_v42, %s3255_s0  ;;  %1878 = vrot.lane.b32.xlu2 %v1857_v42, %s3252_s25 }
 0x5e0   :  { %945 = vrot.lane.b32.xlu1 %v805_v37, %s3274_s7 }
 0x5e7   :  { %1898 = vrot.lane.b32.xlu0 %v1847_v41, %s3260_s30  ;;  %1893 = vrot.lane.b32.xlu2 %v1857_v42, %s3258_s1 }
 0x5e8   :  { %1888 = vrot.lane.b32.xlu1 %v1857_v42, %s3250_s29 }
 0x5ef   :  { %1913 = vrot.lane.b32.xlu0 %v1847_v41, %s3257_s24  ;;  %1908 = vrot.lane.b32.xlu2 %v1847_v41, %s3256_s23 }
 0x5f0   :  { %1903 = vrot.lane.b32.xlu1 %v1847_v41, %s3261_s21 }
 0x5f7   :  { %917 = vrot.lane.b32.xlu0 %v2627_v23, %s3257_s24  ;;  %1923 = vrot.lane.b32.xlu2 %v1857_v42, %s3259_s22 }
 0x5f8   :  { %896 = vrot.lane.b32.xlu1 %v2627_v23, %s3254_s4 }
 0x5f9   :  { %v888_v45 = vpop.permute.xlu2 %887 }
 0x5ff   :  { %1928 = vrot.lane.b32.xlu0 %v1847_v41, %s3273_s20  ;;  %902 = vrot.lane.b32.xlu2 %v2627_v23, %s3259_s22 }
 0x600   :  { %1918 = vrot.lane.b32.xlu1 %v1857_v42, %s3254_s4 }
 0x601   :  { %v2694_v28 = vpop.permute.xlu2 %872 }
 0x607   :  { %1027 = vperm.xlu0 %1745, %v1022_v20   ;;  %889 = vrot.lane.b32.xlu2 %v804_v30, %s3272_s19 }
 0x608   :  { %891 = vrot.lane.b32.xlu1 %v805_v37, %s3272_s19 }
 0x609   :  { %v2704_v29 = vpop.permute.xlu2 %821 }
 0x60f   :  { %1032 = vperm.xlu2 %1744, %v1023_v34  }
 0x610   :  { %1037 = vperm.xlu1 %1746, %v1024_v38  }
 0x611   :  { %v852_v35 = vpop.permute.xlu0 %851  ;;  %v2711_v51 = vpop.permute.xlu2 %932 }
 0x612   :  { %v882_v47 = vpop.permute.xlu1 %881 }
 0x613   :  { %v893_v49 = vsel %vm76_vm7, %v882_v47, %v888_v45 }
 0x614   :  { %1053 = vmatpush.msra.mxu3 %v893_v49 }
 0x616   :  { %1054 = vmatpush.msra.mxu3 %v985_v22 }
 0x618   :  { %1055 = vmatpush.msra.mxu3 %v983_v50 }
 0x619   :  { %v2713_v53 = vpop.permute.xlu0 %836  ;;  %v2717_v55 = vpop.permute.xlu2 %911 }
 0x61a   :  { %v867_v21 = vpop.permute.xlu1 %866 }
 0x61b   :  { %v878_v30 = vsel %vm81_vm6, %v867_v21, %v2694_v28 }
 0x621   :  { %v2715_v32 = vpop.permute.xlu0 %827  ;;  %v1859_v52 = vpop.permute.xlu2 %1858 }
 0x622   :  { %v858_v54 = vpop.permute.xlu1 %857  ;;  %v1861_v5 = vunpack.i.h.bf16 %v1859_v52  ;;  %v1860_v8 = vunpack.i.l.bf16 %v1859_v52  ;;  %v833_v52 = vsel %vm3279_vm9, %v2704_v29, %v2715_v32 }
 0x623   :  { %v863_v18 = vsel %vm85_vm12, %v852_v35, %v858_v54 }
 0x624   :  { %v970_v42 = vrot.slane %v863_v18, 4 }
 0x629   :  { %v2719_v56 = vpop.permute.xlu0 %806  ;;  %v2725_v61 = vpop.permute.xlu2 %1868 }
 0x62a   :  { %v2721_v57 = vpop.permute.xlu1 %842  ;;  %v1870_v24 = vunpack.i.l.bf16 %v2725_v61  ;;  %v1871_v50 = vunpack.i.h.bf16 %v2725_v61 }
 0x631   :  { %v1839_v60 = vpop.permute.xlu0 %1838  ;;  %v952_v62 = vpop.permute.xlu2 %951 }
 0x632   :  { %v2723_v58 = vpop.permute.xlu1 %926  ;;  %v1840_v25 = vunpack.i.l.bf16 %v1839_v60  ;;  %v1841_v45 = vunpack.i.h.bf16 %v1839_v60 }
 0x633   :  { %v938_v29 = vsel %vm79_vm0, %v2723_v58, %v2711_v51 }
 0x639   :  { %v1849_v36 = vpop.permute.xlu0 %1848  ;;  %v1879_v10 = vpop.permute.xlu2 %1878 }
 0x63a   :  { %v2727_v40 = vpop.permute.xlu1 %812  ;;  %v1850_v9 = vunpack.i.l.bf16 %v1849_v36  ;;  %v1851_v12 = vunpack.i.h.bf16 %v1849_v36  ;;  %v1881_v34 = vunpack.i.h.bf16 %v1879_v10  ;;  %v1880_v38 = vunpack.i.l.bf16 %v1879_v10 }
 0x641   :  { %v1864_v0 = vpop.permute.xlu0 %1863  ;;  %v1894_v35 = vpop.permute.xlu2 %1893 }
 0x642   :  { %v1844_v1 = vpop.permute.xlu1 %1843  ;;  %v1866_v2 = vunpack.i.h.bf16 %v1864_v0  ;;  %v1865_v3 = vunpack.i.l.bf16 %v1864_v0 }
 0x643   :  { %v1845_v44 = vunpack.i.l.bf16 %v1844_v1  ;;  %v1846_v33 = vunpack.i.h.bf16 %v1844_v1  ;;  %v1896_v1 = vunpack.i.h.bf16 %v1894_v35 }
 0x644   :  { %v864_v27 = vsel %vm85_vm12, %v1860_v8, %v1865_v3  ;;  %v865_v31 = vsel %vm85_vm12, %v1861_v5, %v1866_v2  ;;  %v1895_v2 = vunpack.i.l.bf16 %v1894_v35  ;;  %v959_v5 = vrot.slane %v833_v52, 4 }
 0x645   :  { %v971_v6 = vrot.slane %v864_v27, 4  ;;  %v973_v39 = vrot.slane %v865_v31, 4  ;;  %v954_v28 = vsel %vm80_vm1, %v1840_v25, %v1845_v44  ;;  %v953_v48 = vsel %vm80_vm1, %v1841_v45, %v1846_v33  ;;  %v1018_v45 = vld [vmem:[%s3172_s9 + $0x10] sm:$0xff] }
 0x647   :  { %v974_v20 = vsel %vm183_vm4, %v971_v6, %v973_v39  ;;  %v972_v49 = vsel %vm183_vm4, %v970_v42, %v971_v6 }
 0x649   :  { %v1874_v63 = vpop.permute.xlu0 %1873 }
 0x64a   :  { %v1854_v4 = vpop.permute.xlu1 %1853  ;;  %v1875_v19 = vunpack.i.l.bf16 %v1874_v63  ;;  %v1876_v47 = vunpack.i.h.bf16 %v1874_v63  ;;  %v848_v63 = vsel %vm3281_vm10, %v2713_v53, %v2721_v57  ;;  %v1003_v53 = vrot.slane %v938_v29, 4 }
 0x64b   :  { %v1855_v11 = vunpack.i.l.bf16 %v1854_v4  ;;  %v1856_v13 = vunpack.i.h.bf16 %v1854_v4 }
 0x64c   :  { %v850_v46 = vsel %vm3276_vm15, %v1870_v24, %v1875_v19  ;;  %v849_v36 = vsel %vm3280_vm5, %v1871_v50, %v1876_v47  ;;  %vm3284_vm15 = vmmov %vm3283_vm3 }
 0x64d   :  { %v880_v14 = vsel %vm81_vm6, %v1850_v9, %v1855_v11  ;;  %v879_v17 = vsel %vm81_vm6, %v1851_v12, %v1856_v13  ;;  %v1012_v21 = vsel %vm183_vm4, %v850_v46, %v970_v42  ;;  %v1909_v11 = vpop.permute.xlu2 %1908 }
 0x64e   :  { %v1013_v15 = vsel %vm183_vm4, %v880_v14, %v981_v43  ;;  %v1910_v58 = vunpack.i.l.bf16 %v1909_v11  ;;  %v1911_v18 = vunpack.i.h.bf16 %v1909_v11 }
 0x64f   :  { %1056 = vmatpush.msra.mxu3 %v1013_v15 }
 0x651   :  { %1057 = vmatpush.msra.mxu3 %v879_v17  ;;  %v1884_v23 = vpop.permute.xlu0 %1883 }
 0x652   :  { %v946_v26 = vpop.permute.xlu1 %945  ;;  %v1886_v59 = vunpack.i.h.bf16 %v1884_v23  ;;  %v1885_v37 = vunpack.i.l.bf16 %v1884_v23 }
 0x653   :  { %1058 = vmatpush.msra.mxu3 %v878_v30  ;;  %v955_v41 = vsel %vm80_vm1, %v946_v26, %v952_v62 }
 0x654   :  { %1696 = vmatpush.msk.msrb.mxu0 %vm183_vm4, %v955_v41  ;;  %v834_v43 = vsel %vm3277_vm13, %v1880_v38, %v1885_v37  ;;  %v835_v22 = vsel %vm3278_vm14, %v1881_v34, %v1886_v59  ;;  %v1016_v59 = vld [vmem:[%s3172_s9] sm:$0xff]  ;;  %v818_v41 = vsel %vm3284_vm15, %v2719_v56, %v2727_v40  ;;  %vm1040_vm13 = vcmask 752640  }
 0x655   :  { %1059 = vmatpush.msra.mxu3 %v974_v20  ;;  %v960_v62 = vrot.slane %v834_v43, 4  ;;  %v962_v0 = vrot.slane %v835_v22, 4  ;;  %v1924_v30 = vpop.permute.xlu2 %1923 }
 0x656   :  { %1084 = vmatpush.msrb.mxu0 %v954_v28  ;;  %v1926_v34 = vunpack.i.h.bf16 %v1924_v30  ;;  %v1925_v38 = vunpack.i.l.bf16 %v1924_v30 }
 0x657   :  { %1060 = vmatpush.msra.mxu3 %v972_v49  ;;  %v963_v8 = vsel %vm183_vm4, %v960_v62, %v962_v0  ;;  %v961_v57 = vsel %vm183_vm4, %v959_v5, %v960_v62 }
 0x658   :  { %1085 = vmatpush.msrb.mxu0 %v953_v48 }
 0x659   :  { %1061 = vmatpush.msra.mxu3 %v1012_v21  ;;  %v1899_v54 = vpop.permute.xlu0 %1898  ;;  %v1020_v21 = vld [vmem:[%s3172_s9 + $0x20] sm:$0xf] }
 0x65a   :  { %v1889_v60 = vpop.permute.xlu1 %1888  ;;  %v1900_v12 = vunpack.i.l.bf16 %v1899_v54  ;;  %v1901_v23 = vunpack.i.h.bf16 %v1899_v54 }
 0x65b   :  { %v1891_v3 = vunpack.i.h.bf16 %v1889_v60  ;;  %v1890_v61 = vunpack.i.l.bf16 %v1889_v60  ;;  %1062 = vmatpush.msra.mxu3 %v849_v36 }
 0x65d   :  { %1063 = vmatpush.msra.mxu3 %v848_v63  ;;  %v939_v32 = vsel %vm79_vm0, %v1890_v61, %v1895_v2  ;;  %v940_v4 = vsel %vm79_vm0, %v1891_v3, %v1896_v1  ;;  %v903_v35 = vpop.permute.xlu2 %902  ;;  %v1017_v1 = vld [vmem:[%s3172_s9 + $0x8] sm:$0xff]  ;;  %v1019_v3 = vld [vmem:[%s3172_s9 + $0x18] sm:$0xff] }
 0x65e   :  { %v1004_v9 = vrot.slane %v939_v32, 4  ;;  %v1006_v10 = vrot.slane %v940_v4, 4  ;;  %v1021_v61 = vld [vmem:[%s3172_s9 + $0x28] sm:$0xf]  ;;  %s3296_s9 = sld [smem:[#allocation8_spill]] }
 0x65f   :  { %1064 = vmatpush.msra.mxu3 %v963_v8 }
 0x660   :  { %v1007_v13 = vsel %vm183_vm4, %v1004_v9, %v1006_v10  ;;  %v1005_v31 = vsel %vm183_vm4, %v1003_v53, %v1004_v9 }
 0x661   :  { %1065 = vmatpush.msra.mxu3 %v961_v57  ;;  %1086 = vmatpush.msrb.mxu0 %v1007_v13  ;;  %v1914_v51 = vpop.permute.xlu0 %1913 }
 0x662   :  { %v1915_v14 = vunpack.i.l.bf16 %v1914_v51  ;;  %v1904_v27 = vpop.permute.xlu1 %1903  ;;  %v1916_v15 = vunpack.i.h.bf16 %v1914_v51 }
 0x663   :  { %v1905_v17 = vunpack.i.l.bf16 %v1904_v27  ;;  %1087 = vmatpush.msrb.mxu0 %v1005_v31  ;;  %v1906_v6 = vunpack.i.h.bf16 %v1904_v27 }
 0x664   :  { %v925_v39 = vsel %vm78_vm2, %v1910_v58, %v1915_v14  ;;  %v924_v25 = vsel %vm78_vm2, %v1911_v18, %v1916_v15 }
 0x665   :  { %v820_v44 = vsel %vm3282_vm11, %v1900_v12, %v1905_v17  ;;  %v1015_v19 = vsel %vm183_vm4, %v925_v39, %v1003_v53  ;;  %v819_v26 = vsel %vm3283_vm3, %v1901_v23, %v1906_v6  ;;  %v890_v0 = vpop.permute.xlu2 %889  ;;  %v1193_v17 = vld [vmem:[%s3173_s12 + $0x10] sm:$0xf]  ;;  %v1191_v6 = vld [vmem:[%s3173_s12] sm:$0xff] }
 0x666   :  { %v1011_v24 = vsel %vm183_vm4, %v820_v44, %v959_v5  ;;  %1088 = vmatpush.msrb.mxu0 %v1015_v19 }
 0x667   :  { %1066 = vmatpush.msra.mxu3 %v1011_v24 }
 0x668   :  { %1089 = vmatpush.msrb.mxu0 %v924_v25 }
 0x669   :  { %1067 = vmatpush.msra.mxu3 %v819_v26  ;;  %v918_v33 = vpop.permute.xlu0 %917 }
 0x66a   :  { %v897_v37 = vpop.permute.xlu1 %896  ;;  %v923_v42 = vsel %vm78_vm2, %v2717_v55, %v918_v33 }
 0x66b   :  { %1068 = vmatpush.msra.mxu3 %v818_v41  ;;  %1090 = vmatpush.msrb.mxu0 %v923_v42  ;;  %v908_v56 = vsel %vm77_vm8, %v897_v37, %v903_v35  ;;  %v1192_v42 = vld [vmem:[%s3173_s12 + $0x8] sm:$0xff] }
 0x66c   :  { %1069 = vmatmul.f32.vlgmr.msra.gmra.mxu3 %v1016_v59  ;;  %v992_v43 = vrot.slane %v908_v56, 4 }
 0x66d   :  { %v1033_v10 = vpop.permute.xlu2 %1032 }
 0x671   :  { %v1929_v47 = vpop.permute.xlu0 %1928 }
 0x672   :  { %v1919_v20 = vpop.permute.xlu1 %1918  ;;  %v1930_v50 = vunpack.i.l.bf16 %v1929_v47  ;;  %v1931_v54 = vunpack.i.h.bf16 %v1929_v47 }
 0x673   :  { %v1921_v28 = vunpack.i.h.bf16 %v1919_v20  ;;  %v1920_v46 = vunpack.i.l.bf16 %v1919_v20 }
 0x674   :  { %1072 = vmatmul.f32.gmra.mxu3 %v1018_v45  ;;  %v894_v2 = vsel %vm76_vm7, %v1931_v54, %v890_v0 }
 0x675   :  { %v909_v55 = vsel %vm77_vm8, %v1920_v46, %v1925_v38  ;;  %v910_v40 = vsel %vm77_vm8, %v1921_v28, %v1926_v34 }
 0x676   :  { %v993_v49 = vrot.slane %v909_v55, 4  ;;  %v995_v48 = vrot.slane %v910_v40, 4 }
 0x678   :  { %v996_v22 = vsel %vm183_vm4, %v993_v49, %v995_v48  ;;  %v994_v60 = vsel %vm183_vm4, %v992_v43, %v993_v49 }
 0x679   :  { %1091 = vmatpush.msrb.mxu0 %v996_v22  ;;  %v1028_v29 = vpop.permute.xlu0 %1027 }
 0x67a   :  { %v892_v52 = vpop.permute.xlu1 %891 }
 0x67b   :  { %v895_v36 = vsel %vm76_vm7, %v1930_v50, %v892_v52  ;;  %1092 = vmatpush.msrb.mxu0 %v994_v60  ;;  %v1134_v52 = vld [vmem:[%s3174_s11] sm:$0xff] }
 0x67c   :  { %1075 = vmatmul.f32.gmra.mxu3 %v1020_v21  ;;  %v1014_v62 = vsel %vm183_vm4, %v895_v36, %v992_v43 }
 0x67d   :  { %1093 = vmatpush.msrb.mxu0 %v1014_v62 }
 0x67f   :  { %1094 = vmatpush.msrb.mxu0 %v894_v2 }
 0x680   :  { %1697 = vmatmul.msk.f32.vlgmr.msrb.gmra.mxu0 %vm1040_vm13, %v1017_v1 }
 0x682   :  { %v1038_v58 = vpop.permute.xlu1 %1037 }
 0x688   :  { %1698 = vmatmul.msk.f32.gmra.mxu0 %vm1040_vm13, %v1019_v3  ;;  %v1135_v3 = vld [vmem:[%s3174_s11 + $0x8] sm:$0xff] }
 0x690   :  { %1699 = vmatmul.msk.f32.gmra.mxu0 %vm1040_vm13, %v1021_v61 }
 0x6ef   :  { %v1070_v63 = vpop.f32.mrf.mxu3 }
 0x6f0   :  { %v1071_v32 = vadd.f32 %v1070_v63, %v1028_v29 }
 0x6f7   :  { %v1073_v8 = vpop.f32.mrf.mxu3 }
 0x6f8   :  { %v1074_v11 = vadd.f32 %v1073_v8, %v1033_v10  ;;  %v1136_v10 = vld [vmem:[%s3174_s11 + $0x10] sm:$0xf] }
 0x6fd   :  { %v1096_v4 = vpop.f32.mrf.mxu0 }
 0x6fe   :  { %v1097_v5 = vadd.f32 %v1096_v4, %v1071_v32 }
 0x6ff   :  { %v1076_v51 = vpop.f32.mrf.mxu3 }
 0x700   :  { %v1105_v9 = vmax.f32 %v1097_v5, 0.0  ;;  %v1077_v14 = vadd.f32 %v1076_v51, %v1038_v58 }
 0x702   :  { %1108 = vadd.xlane.f32.xlu0 %v1105_v9 }
 0x705   :  { %v1099_v53 = vpop.f32.mrf.mxu0 }
 0x706   :  { %v1100_v57 = vadd.f32 %v1099_v53, %v1074_v11 }
 0x708   :  { %v1106_v13 = vmax.f32 %v1100_v57, 0.0 }
 0x70a   :  { %1110 = vadd.xlane.f32.xlu2 %v1106_v13 }
 0x70d   :  { %v1102_v27 = vpop.f32.mrf.mxu0 }
 0x70e   :  { %v1103_v31 = vadd.f32 %v1102_v27, %v1077_v14 }
 0x710   :  { %v1107_v12 = vmax.f32 %v1103_v31, 0.0 }
 0x712   :  { %v1112_v15 = vsel %vm183_vm4, %v1107_v12, 0.0 }
 0x713   :  { %1113 = vadd.xlane.f32.xlu1 %v1112_v15 }
 0x716   :  { %1206 = vperm.xlu0 %1745, %v1193_v17  }
 0x72c   :  { %1196 = vperm.xlu1 %1746, %v1191_v6  }
 0x775   :  { %v1109_v39 = vpop.xlane.xlu0 %1108 }
 0x776   :  { %v1115_v18 = vmul.f32 %v1109_v39, %v2290_v16 }
 0x778   :  { %v2842_v44 = vsub.f32 %v1105_v9, %v1115_v18 }
 0x77a   :  { %v1121_v19 = vmul.f32 %v2842_v44, %v2842_v44 }
 0x77c   :  { %1124 = vadd.xlane.f32.xlu0 %v1121_v19 }
 0x77d   :  { %v1111_v23 = vpop.xlane.xlu2 %1110 }
 0x77e   :  { %v1116_v24 = vmul.f32 %v1111_v23, %v2290_v16 }
 0x780   :  { %v2847_v25 = vsub.f32 %v1106_v13, %v1116_v24  ;;  %v1430_v24 = vld [vmem:[%s3175_s14 + $0x10] sm:$0xf] }
 0x782   :  { %v1122_v26 = vmul.f32 %v2847_v25, %v2847_v25 }
 0x784   :  { %1126 = vadd.xlane.f32.xlu2 %v1122_v26  ;;  %v1428_v26 = vld [vmem:[%s3175_s14] sm:$0xff] }
 0x786   :  { %v1114_v30 = vpop.xlane.xlu1 %1113 }
 0x787   :  { %v1117_v33 = vmul.f32 %v1114_v30, %v2290_v16  ;;  %v1429_v30 = vld [vmem:[%s3175_s14 + $0x8] sm:$0xff]  ;;  %s3297_s14 = sld [smem:[#allocation9_spill]] }
 0x788   :  { %v2860_v45 = vpop.permute.xlu0 %1206 }
 0x789   :  { %v2852_v59 = vsub.f32 %v1107_v12, %v1117_v33 }
 0x78b   :  { %v1123_v37 = vmul.f32 %v2852_v59, %v2852_v59 }
 0x78d   :  { %v1128_v41 = vsel %vm183_vm4, %v1123_v37, 0.0 }
 0x78e   :  { %1129 = vadd.xlane.f32.xlu1 %v1128_v41 }
 0x790   :  { %1201 = vperm.xlu0 %1745, %v1192_v42  }
 0x79e   :  { %v1197_v46 = vpop.permute.xlu1 %1196 }
 0x7ef   :  { %v1125_v20 = vpop.xlane.xlu0 %1124 }
 0x7f0   :  { %v1131_v34 = vmul.f32 %v1125_v20, %v2290_v16 }
 0x7f2   :  { %v1137_v38 = vadd.f32 1e-05, %v1131_v34 }
 0x7f4   :  { %2041 = vrsqrt.f32 %v1137_v38  ;;  %vm1146_vm9 = vweird.f32 %v1137_v38 }
 0x7f7   :  { %v1127_v35 = vpop.xlane.xlu2 %1126 }
 0x7f8   :  { %v1132_v28 = vmul.f32 %v1127_v35, %v2290_v16 }
 0x7fa   :  { %v2042_v56 = vpop.eup %2041  ;;  %v1138_v55 = vadd.f32 1e-05, %v1132_v28 }
 0x7fb   :  { %v1141_v40 = vmul.f32 %v2042_v56, %v1137_v38  ;;  %vm1147_vm14 = vweird.f32 %v2042_v56 }
 0x7fc   :  { %2043 = vrsqrt.f32 %v1138_v55  ;;  %vm1148_vm5 = vmor %vm1146_vm9, %vm1147_vm14  ;;  %vm1156_vm11 = vweird.f32 %v1138_v55 }
 0x7fd   :  { %v1142_v47 = vmul.f32 %v2042_v56, %v1141_v40 }
 0x7ff   :  { %v1143_v49 = vmul.f32 0.5, %v1142_v47 }
 0x801   :  { %v1144_v48 = vsub.f32 1.5, %v1143_v49  ;;  %v1130_v43 = vpop.xlane.xlu1 %1129 }
 0x802   :  { %v2044_v22 = vpop.eup %2043  ;;  %v1133_v50 = vmul.f32 %v1130_v43, %v2290_v16  ;;  %v1202_v13 = vpop.permute.xlu0 %1201 }
 0x803   :  { %v1145_v21 = vmul.f32 %v2042_v56, %v1144_v48  ;;  %v1151_v54 = vmul.f32 %v2044_v22, %v1138_v55  ;;  %vm1157_vm10 = vweird.f32 %v2044_v22 }
 0x804   :  { %v1139_v60 = vadd.f32 1e-05, %v1133_v50  ;;  %vm1158_vm3 = vmor %vm1156_vm11, %vm1157_vm10 }
 0x805   :  { %v1152_v36 = vmul.f32 %v2044_v22, %v1151_v54  ;;  %v1149_v62 = vsel %vm1148_vm5, %v2042_v56, %v1145_v21  ;;  %vm3286_vm5 = vcmp.ge.s32.totalorder %v2220_v7, 4 }
 0x806   :  { %2045 = vrsqrt.f32 %v1139_v60  ;;  %v1170_v0 = vmul.f32 %v1149_v62, %v1134_v52  ;;  %vm1166_vm14 = vweird.f32 %v1139_v60  ;;  %vm3287_vm10 = vmmov %vm3286_vm5 }
 0x807   :  { %v1153_v1 = vmul.f32 0.5, %v1152_v36 }
 0x808   :  { %1175 = vperm.xlu0 %1745, %v1170_v0  }
 0x809   :  { %v1154_v2 = vsub.f32 1.5, %v1153_v1 }
 0x80b   :  { %v1155_v61 = vmul.f32 %v2044_v22, %v1154_v2 }
 0x80c   :  { %v2046_v63 = vpop.eup %2045 }
 0x80d   :  { %v1161_v29 = vmul.f32 %v2046_v63, %v1139_v60  ;;  %v1159_v32 = vsel %vm1158_vm3, %v2044_v22, %v1155_v61  ;;  %vm1167_vm15 = vweird.f32 %v2046_v63  ;;  %vm3289_vm3 = vmmov %vm3286_vm5 }
 0x80e   :  { %v1171_v4 = vmul.f32 %v1159_v32, %v1135_v3  ;;  %vm1168_vm9 = vmor %vm1166_vm14, %vm1167_vm15  ;;  %vm3291_vm14 = vcmp.ge.s32.totalorder %v2220_v7, 6 }
 0x80f   :  { %v1162_v5 = vmul.f32 %v2046_v63, %v1161_v29 }
 0x810   :  { %1180 = vperm.xlu1 %1746, %v1171_v4  }
 0x811   :  { %v1163_v8 = vmul.f32 0.5, %v1162_v5 }
 0x813   :  { %v1164_v9 = vsub.f32 1.5, %v1163_v8 }
 0x815   :  { %v1165_v11 = vmul.f32 %v2046_v63, %v1164_v9 }
 0x817   :  { %v1169_v53 = vsel %vm1168_vm9, %v2046_v63, %v1165_v11  ;;  %vm3292_vm9 = vmmov %vm3291_vm14 }
 0x818   :  { %v1172_v57 = vmul.f32 %v1169_v53, %v1136_v10 }
 0x81a   :  { %1185 = vperm.xlu2 %1744, %v1172_v57  }
 0x874   :  { %v1186_v31 = vpop.permute.xlu2 %1185 }
 0x875   :  { %v1190_v15 = vmul.f32 %v1186_v31, %v2852_v59 }
 0x877   :  { %v1211_v6 = vadd.f32 %v2860_v45, %v1190_v15 }
 0x879   :  { %v1390_v45 = vrot.slane %v1211_v6, 4 }
 0x87a   :  { %v1176_v51 = vpop.permute.xlu0 %1175 }
 0x87b   :  { %v1188_v58 = vmul.f32 %v1176_v51, %v2842_v44 }
 0x87d   :  { %v2875_v14 = vadd.f32 %v1197_v46, %v1188_v58 }
 0x87f   :  { %1257 = vrot.lane.b32.xlu0 %v2875_v14, %s3271_s18  ;;  %1293 = vrot.lane.b32.xlu1 %v2875_v14, %s3272_s19  ;;  %v1387_v34 = vrot.slane %v2875_v14, 4 }
 0x880   :  { %1287 = vrot.lane.b32.xlu2 %v2875_v14, %s3273_s20 }
 0x882   :  { %v1181_v27 = vpop.permute.xlu1 %1180 }
 0x883   :  { %v1189_v12 = vmul.f32 %v1181_v27, %v2847_v25 }
 0x885   :  { %v1210_v17 = vadd.f32 %v1202_v13, %v1189_v12 }
 0x887   :  { %1242 = vrot.lane.b32.xlu0 %v2875_v14, %s3249_s27  ;;  %1278 = vrot.lane.b32.xlu1 %v2875_v14, %s3247_s3  ;;  %v1937_v39 = vpack.i.bf16 %v2875_v14, %v1210_v17  ;;  %v1947_v18 = vpack.i.bf16 %v1210_v17, %v1211_v6  ;;  %v1952_v44 = vpack.i.bf16 %v1211_v6, %v1210_v17  ;;  %v1388_v33 = vrot.slane %v1210_v17, 4 }
 0x888   :  { %1272 = vrot.lane.b32.xlu2 %v2875_v14, %s3248_s26 }
 0x889   :  { %v1391_v20 = vsel %vm183_vm4, %v1388_v33, %v1390_v45  ;;  %v1389_v38 = vsel %vm183_vm4, %v1387_v34, %v1388_v33 }
 0x88f   :  { %1233 = vrot.lane.b32.xlu0 %v2875_v14, %s3255_s0  ;;  %1227 = vrot.lane.b32.xlu1 %v2875_v14, %s3252_s25 }
 0x890   :  { %1263 = vrot.lane.b32.xlu2 %v2875_v14, %s3251_s2 }
 0x897   :  { %1212 = vrot.lane.b32.xlu0 %v2875_v14, %s3260_s30  ;;  %1332 = vrot.lane.b32.xlu1 %v2875_v14, %s3250_s29 }
 0x898   :  { %1248 = vrot.lane.b32.xlu2 %v2875_v14, %s3253_s28 }
 0x89f   :  { %1338 = vrot.lane.b32.xlu0 %v2875_v14, %s3258_s1  ;;  %1317 = vrot.lane.b32.xlu1 %v2875_v14, %s3256_s23 }
 0x8a0   :  { %1218 = vrot.lane.b32.xlu2 %v2875_v14, %s3261_s21 }
 0x8a7   :  { %1938 = vrot.lane.b32.xlu0 %v1937_v39, %s3275_s6  ;;  %1933 = vrot.lane.b32.xlu1 %v1937_v39, %s3274_s7 }
 0x8a8   :  { %1948 = vrot.lane.b32.xlu2 %v1947_v18, %s3247_s3 }
 0x8af   :  { %1943 = vrot.lane.b32.xlu0 %v1947_v18, %s3248_s26  ;;  %1953 = vrot.lane.b32.xlu1 %v1952_v44, %s3271_s18 }
 0x8b0   :  { %1973 = vrot.lane.b32.xlu2 %v1952_v44, %s3252_s25  ;;  %s3300_s25 = sld [smem:[#allocation11_spill]] }
 0x8b7   :  { %1958 = vrot.lane.b32.xlu0 %v1952_v44, %s3251_s2  ;;  %1963 = vrot.lane.b32.xlu1 %v1947_v18, %s3249_s27  ;;  %s3299_s27 = sld [smem:[#allocation2_spill]] }
 0x8b8   :  { %1983 = vrot.lane.b32.xlu2 %v1947_v18, %s3260_s30  ;;  %s3293_s30 = sld [smem:[#allocation6_spill]] }
 0x8bf   :  { %1968 = vrot.lane.b32.xlu0 %v1947_v18, %s3253_s28  ;;  %1978 = vrot.lane.b32.xlu1 %v1952_v44, %s3255_s0 }
 0x8c0   :  { %1302 = vrot.lane.b32.xlu2 %v2875_v14, %s3254_s4 }
 0x8c7   :  { %1351 = vrot.lane.b32.xlu0 %v1211_v6, %s3274_s7  ;;  %1988 = vrot.lane.b32.xlu1 %v1947_v18, %s3261_s21 }
 0x8c8   :  { %1357 = vrot.lane.b32.xlu2 %v1211_v6, %s3275_s6 }
 0x8cf   :  { %1323 = vrot.lane.b32.xlu0 %v2875_v14, %s3257_s24  ;;  %1998 = vrot.lane.b32.xlu1 %v1952_v44, %s3258_s1 }
 0x8d0   :  { %1993 = vrot.lane.b32.xlu2 %v1952_v44, %s3250_s29 }
 0x8d7   :  { %2013 = vrot.lane.b32.xlu0 %v1952_v44, %s3254_s4  ;;  %2008 = vrot.lane.b32.xlu1 %v1947_v18, %s3257_s24 }
 0x8d8   :  { %2003 = vrot.lane.b32.xlu2 %v1947_v18, %s3256_s23 }
 0x8da   :  { %v1288_v19 = vpop.permute.xlu2 %1287 }
 0x8df   :  { %2023 = vrot.lane.b32.xlu0 %v1947_v18, %s3273_s20  ;;  %1308 = vrot.lane.b32.xlu1 %v2875_v14, %s3259_s22 }
 0x8e0   :  { %2018 = vrot.lane.b32.xlu2 %v1952_v44, %s3259_s22  ;;  %s3298_s22 = sld [smem:[#allocation10_spill]] }
 0x8e2   :  { %v1273_v23 = vpop.permute.xlu2 %1272 }
 0x8e7   :  { %1443 = vperm.xlu0 %1745, %v1430_v24   ;;  %1295 = vrot.lane.b32.xlu1 %v1210_v17, %s3272_s19 }
 0x8e8   :  { %1297 = vrot.lane.b32.xlu2 %v1211_v6, %s3272_s19 }
 0x8ea   :  { %v1264_v25 = vpop.permute.xlu2 %1263 }
 0x8ef   :  { %1433 = vperm.xlu1 %1746, %v1428_v26  }
 0x8f0   :  { %1438 = vperm.xlu2 %1744, %v1429_v30  }
 0x8f1   :  { %v1258_v59 = vpop.permute.xlu0 %1257  ;;  %v1294_v37 = vpop.permute.xlu1 %1293 }
 0x8f2   :  { %v2949_v41 = vpop.permute.xlu2 %1248  ;;  %v1299_v42 = vsel %vm76_vm7, %v1288_v19, %v1294_v37  ;;  %v1269_v53 = vsel %vm85_vm12, %v1258_v59, %v1264_v25 }
 0x8f3   :  { %1458 = vmatpush.msrb.mxu2 %v1299_v42  ;;  %v1376_v14 = vrot.slane %v1269_v53, 4 }
 0x8f5   :  { %1459 = vmatpush.msrb.mxu2 %v1391_v20 }
 0x8f7   :  { %1460 = vmatpush.msrb.mxu2 %v1389_v38 }
 0x8f9   :  { %v2956_v35 = vpop.permute.xlu0 %1242  ;;  %v1279_v28 = vpop.permute.xlu1 %1278 }
 0x8fa   :  { %v2958_v46 = vpop.permute.xlu2 %1218  ;;  %v1284_v5 = vsel %vm81_vm6, %v1273_v23, %v1279_v28 }
 0x901   :  { %v1234_v56 = vpop.permute.xlu0 %1233  ;;  %v1228_v55 = vpop.permute.xlu1 %1227 }
 0x902   :  { %v1949_v40 = vpop.permute.xlu2 %1948  ;;  %v1239_v20 = vsel %vm3289_vm3, %v1228_v55, %v1234_v56 }
 0x903   :  { %v1950_v62 = vunpack.i.l.bf16 %v1949_v40  ;;  %v1951_v3 = vunpack.i.h.bf16 %v1949_v40 }
 0x909   :  { %v2960_v47 = vpop.permute.xlu0 %1212  ;;  %v2962_v49 = vpop.permute.xlu1 %1332 }
 0x90a   :  { %v1974_v48 = vpop.permute.xlu2 %1973 }
 0x90b   :  { %v1976_v31 = vunpack.i.h.bf16 %v1974_v48  ;;  %v1975_v12 = vunpack.i.l.bf16 %v1974_v48 }
 0x911   :  { %v2964_v43 = vpop.permute.xlu0 %1338  ;;  %v2966_v22 = vpop.permute.xlu1 %1317 }
 0x912   :  { %v2968_v50 = vpop.permute.xlu2 %1983  ;;  %v1344_v53 = vsel %vm79_vm0, %v2962_v49, %v2964_v43 }
 0x913   :  { %v1985_v28 = vunpack.i.l.bf16 %v2968_v50 }
 0x919   :  { %v2970_v21 = vpop.permute.xlu0 %1938  ;;  %v2972_v54 = vpop.permute.xlu1 %1933 }
 0x91a   :  { %v2974_v52 = vpop.permute.xlu2 %1302  ;;  %v1935_v38 = vunpack.i.l.bf16 %v2972_v54 }
 0x921   :  { %v1944_v60 = vpop.permute.xlu0 %1943  ;;  %v1954_v36 = vpop.permute.xlu1 %1953 }
 0x922   :  { %v1945_v0 = vunpack.i.l.bf16 %v1944_v60  ;;  %v1946_v1 = vunpack.i.h.bf16 %v1944_v60  ;;  %v1358_v29 = vpop.permute.xlu2 %1357  ;;  %v1956_v8 = vunpack.i.h.bf16 %v1954_v36  ;;  %v1955_v9 = vunpack.i.l.bf16 %v1954_v36 }
 0x923   :  { %v1941_v36 = vunpack.i.h.bf16 %v2970_v21 }
 0x924   :  { %v1286_v2 = vsel %vm81_vm6, %v1945_v0, %v1950_v62  ;;  %v1285_v63 = vsel %vm81_vm6, %v1946_v1, %v1951_v3  ;;  %v1936_v62 = vunpack.i.h.bf16 %v2972_v54  ;;  %v1365_v0 = vrot.slane %v1239_v20, 4 }
 0x925   :  { %v1419_v61 = vsel %vm183_vm4, %v1286_v2, %v1387_v34  ;;  %v1940_v34 = vunpack.i.l.bf16 %v2970_v21 }
 0x926   :  { %1461 = vmatpush.msrb.mxu2 %v1419_v61  ;;  %v1359_v3 = vsel %vm80_vm1, %v1936_v62, %v1941_v36  ;;  %v1986_v61 = vunpack.i.h.bf16 %v2968_v50 }
 0x928   :  { %1462 = vmatpush.msrb.mxu2 %v1285_v63 }
 0x929   :  { %v1959_v32 = vpop.permute.xlu0 %1958  ;;  %v1964_v4 = vpop.permute.xlu1 %1963 }
 0x92a   :  { %v1961_v10 = vunpack.i.h.bf16 %v1959_v32  ;;  %v1960_v11 = vunpack.i.l.bf16 %v1959_v32  ;;  %1463 = vmatpush.msrb.mxu2 %v1284_v5  ;;  %v1965_v39 = vunpack.i.l.bf16 %v1964_v4  ;;  %v1994_v18 = vpop.permute.xlu2 %1993  ;;  %v1966_v33 = vunpack.i.h.bf16 %v1964_v4 }
 0x92b   :  { %v1996_v5 = vunpack.i.h.bf16 %v1994_v18 }
 0x92c   :  { %v1270_v57 = vsel %vm85_vm12, %v1955_v9, %v1960_v11  ;;  %v1271_v13 = vsel %vm85_vm12, %v1956_v8, %v1961_v10  ;;  %vm3285_vm12 = vcmp.ge.s32.totalorder %v2220_v7, 3  ;;  %v1995_v8 = vunpack.i.l.bf16 %v1994_v18  ;;  %v1422_v11 = vld [vmem:[%s3293_s30] sm:$0xff]  ;;  %v1424_v18 = vld [vmem:[%s3293_s30 + $0x10] sm:$0xff] }
 0x92d   :  { %v1377_v51 = vrot.slane %v1270_v57, 4  ;;  %v1379_v58 = vrot.slane %v1271_v13, 4  ;;  %vm3288_vm11 = vmmov %vm3285_vm12 }
 0x92e   :  { %vm3290_vm15 = vmmov %vm3288_vm11 }
 0x92f   :  { %v1380_v27 = vsel %vm183_vm4, %v1377_v51, %v1379_v58  ;;  %v1378_v6 = vsel %vm183_vm4, %v1376_v14, %v1377_v51  ;;  %v1254_v60 = vsel %vm3290_vm15, %v2956_v35, %v2949_v41  ;;  %v1360_v41 = vsel %vm80_vm1, %v1935_v38, %v1940_v34  ;;  %v1426_v38 = vld [vmem:[%s3293_s30 + $0x20] sm:$0xf] }
 0x930   :  { %1464 = vmatpush.msrb.mxu2 %v1380_v27  ;;  %v1409_v27 = vrot.slane %v1344_v53, 4  ;;  %vm1654_vm15 = vcmask 490496  }
 0x931   :  { %v1969_v15 = vpop.permute.xlu0 %1968  ;;  %v1979_v17 = vpop.permute.xlu1 %1978 }
 0x932   :  { %v1970_v44 = vunpack.i.l.bf16 %v1969_v15  ;;  %v1981_v19 = vunpack.i.h.bf16 %v1979_v17  ;;  %v1980_v23 = vunpack.i.l.bf16 %v1979_v17  ;;  %1465 = vmatpush.msrb.mxu2 %v1378_v6  ;;  %v1971_v24 = vunpack.i.h.bf16 %v1969_v15  ;;  %v2004_v2 = vpop.permute.xlu2 %2003 }
 0x934   :  { %v1256_v25 = vsel %vm3285_vm12, %v1965_v39, %v1970_v44  ;;  %v1240_v26 = vsel %vm3286_vm5, %v1975_v12, %v1980_v23  ;;  %v1241_v30 = vsel %vm3287_vm10, %v1976_v31, %v1981_v19  ;;  %v1255_v37 = vsel %vm3288_vm11, %v1966_v33, %v1971_v24 }
 0x935   :  { %v1418_v59 = vsel %vm183_vm4, %v1256_v25, %v1376_v14  ;;  %v1366_v42 = vrot.slane %v1240_v26, 4  ;;  %v1368_v45 = vrot.slane %v1241_v30, 4  ;;  %v2006_v25 = vunpack.i.h.bf16 %v2004_v2 }
 0x936   :  { %1466 = vmatpush.msrb.mxu2 %v1418_v59 }
 0x937   :  { %v1369_v1 = vsel %vm183_vm4, %v1366_v42, %v1368_v45  ;;  %v1367_v54 = vsel %vm183_vm4, %v1365_v0, %v1366_v42 }
 0x938   :  { %1467 = vmatpush.msrb.mxu2 %v1255_v37 }
 0x939   :  { %v1352_v40 = vpop.permute.xlu0 %1351  ;;  %v1989_v48 = vpop.permute.xlu1 %1988 }
 0x93a   :  { %v1361_v56 = vsel %vm80_vm1, %v1352_v40, %v1358_v29  ;;  %v1990_v55 = vunpack.i.l.bf16 %v1989_v48  ;;  %1468 = vmatpush.msrb.mxu2 %v1254_v60  ;;  %v1991_v21 = vunpack.i.h.bf16 %v1989_v48  ;;  %vm3294_vm1 = vmmov %vm3292_vm9  ;;  %v2019_v14 = vpop.permute.xlu2 %2018 }
 0x93b   :  { %1700 = vmatpush.msk.msra.mxu0 %vm183_vm4, %v1361_v56  ;;  %1710 = vmatpush.msk.msrb.mxu3 %vm183_vm4, %v1361_v56  ;;  %v1224_v50 = vsel %vm3294_vm1, %v2960_v47, %v2958_v46  ;;  %v2005_v46 = vunpack.i.l.bf16 %v2004_v2  ;;  %v2021_v47 = vunpack.i.h.bf16 %v2019_v14  ;;  %v2020_v15 = vunpack.i.l.bf16 %v2019_v14  ;;  %v1423_v56 = vld [vmem:[%s3293_s30 + $0x8] sm:$0xff] }
 0x93c   :  { %1469 = vmatpush.msrb.mxu2 %v1369_v1  ;;  %v1226_v35 = vsel %vm3291_vm14, %v1985_v28, %v1990_v55  ;;  %v1225_v4 = vsel %vm3292_vm9, %v1986_v61, %v1991_v21  ;;  %v1427_v55 = vld [vmem:[%s3293_s30 + $0x28] sm:$0xf]  ;;  %v1425_v1 = vld [vmem:[%s3293_s30 + $0x18] sm:$0xff] }
 0x93d   :  { %1489 = vmatpush.msra.mxu0 %v1360_v41  ;;  %1711 = vmatpush.msrb.mxu3 %v1360_v41  ;;  %v1417_v63 = vsel %vm183_vm4, %v1226_v35, %v1365_v0 }
 0x93e   :  { %1470 = vmatpush.msrb.mxu2 %v1367_v54 }
 0x93f   :  { %1490 = vmatpush.msra.mxu0 %v1359_v3  ;;  %1712 = vmatpush.msrb.mxu3 %v1359_v3 }
 0x940   :  { %1471 = vmatpush.msrb.mxu2 %v1417_v63 }
 0x941   :  { %v1324_v29 = vpop.permute.xlu0 %1323  ;;  %v1999_v32 = vpop.permute.xlu1 %1998 }
 0x942   :  { %v2001_v9 = vunpack.i.h.bf16 %v1999_v32  ;;  %v2000_v10 = vunpack.i.l.bf16 %v1999_v32  ;;  %1472 = vmatpush.msrb.mxu2 %v1225_v4  ;;  %v1329_v45 = vsel %vm78_vm2, %v2966_v22, %v1324_v29  ;;  %v1298_v28 = vpop.permute.xlu2 %1297 }
 0x944   :  { %v1345_v57 = vsel %vm79_vm0, %v1995_v8, %v2000_v10  ;;  %v1346_v13 = vsel %vm79_vm0, %v1996_v5, %v2001_v9  ;;  %1473 = vmatpush.msrb.mxu2 %v1224_v50 }
 0x945   :  { %1474 = vmatmul.f32.vlgmr.msrb.gmra.mxu2 %v1422_v11  ;;  %v1410_v51 = vrot.slane %v1345_v57, 4  ;;  %v1412_v58 = vrot.slane %v1346_v13, 4 }
 0x947   :  { %v1413_v31 = vsel %vm183_vm4, %v1410_v51, %v1412_v58  ;;  %v1411_v43 = vsel %vm183_vm4, %v1409_v27, %v1410_v51 }
 0x948   :  { %1491 = vmatpush.msra.mxu0 %v1413_v31  ;;  %1713 = vmatpush.msrb.mxu3 %v1413_v31 }
 0x949   :  { %v2014_v12 = vpop.permute.xlu0 %2013  ;;  %v2009_v49 = vpop.permute.xlu1 %2008 }
 0x94a   :  { %v2016_v17 = vunpack.i.h.bf16 %v2014_v12  ;;  %v2015_v6 = vunpack.i.l.bf16 %v2014_v12  ;;  %v2010_v39 = vunpack.i.l.bf16 %v2009_v49  ;;  %1492 = vmatpush.msra.mxu0 %v1411_v43  ;;  %1714 = vmatpush.msrb.mxu3 %v1411_v43  ;;  %v2011_v44 = vunpack.i.h.bf16 %v2009_v49  ;;  %v1439_v4 = vpop.permute.xlu2 %1438 }
 0x94c   :  { %v1315_v19 = vsel %vm77_vm8, %v2015_v6, %v2020_v15  ;;  %v1316_v23 = vsel %vm77_vm8, %v2016_v17, %v2021_v47  ;;  %v1331_v24 = vsel %vm78_vm2, %v2005_v46, %v2010_v39  ;;  %v1330_v30 = vsel %vm78_vm2, %v2006_v25, %v2011_v44  ;;  %v1598_v6 = vld [vmem:[%s3295_s8 + $0x10] sm:$0xf]  ;;  %v1597_v39 = vld [vmem:[%s3295_s8 + $0x8] sm:$0xff] }
 0x94d   :  { %1477 = vmatmul.f32.gmra.mxu2 %v1424_v18  ;;  %v1421_v26 = vsel %vm183_vm4, %v1331_v24, %v1409_v27  ;;  %v1399_v33 = vrot.slane %v1315_v19, 4  ;;  %v1401_v59 = vrot.slane %v1316_v23, 4 }
 0x94e   :  { %1493 = vmatpush.msra.mxu0 %v1421_v26  ;;  %1715 = vmatpush.msrb.mxu3 %v1421_v26 }
 0x94f   :  { %v1402_v48 = vsel %vm183_vm4, %v1399_v33, %v1401_v59 }
 0x950   :  { %1494 = vmatpush.msra.mxu0 %v1330_v30  ;;  %1716 = vmatpush.msrb.mxu3 %v1330_v30 }
 0x951   :  { %v2024_v37 = vpop.permute.xlu0 %2023  ;;  %v1309_v42 = vpop.permute.xlu1 %1308 }
 0x952   :  { %v2025_v20 = vunpack.i.l.bf16 %v2024_v37  ;;  %v1314_v34 = vsel %vm77_vm8, %v2974_v52, %v1309_v42  ;;  %1495 = vmatpush.msra.mxu0 %v1329_v45  ;;  %1717 = vmatpush.msrb.mxu3 %v1329_v45  ;;  %v2026_v36 = vunpack.i.h.bf16 %v2024_v37 }
 0x953   :  { %v1398_v40 = vrot.slane %v1314_v34, 4 }
 0x954   :  { %1496 = vmatpush.msra.mxu0 %v1402_v48  ;;  %1718 = vmatpush.msrb.mxu3 %v1402_v48  ;;  %v1301_v22 = vsel %vm76_vm7, %v2025_v20, %v1298_v28  ;;  %v1539_v48 = vld [vmem:[%s3296_s9] sm:$0xff] }
 0x955   :  { %1480 = vmatmul.f32.gmra.mxu2 %v1426_v38  ;;  %v1400_v60 = vsel %vm183_vm4, %v1398_v40, %v1399_v33  ;;  %v1420_v52 = vsel %vm183_vm4, %v1301_v22, %v1398_v40 }
 0x956   :  { %1497 = vmatpush.msra.mxu0 %v1400_v60  ;;  %1719 = vmatpush.msrb.mxu3 %v1400_v60 }
 0x958   :  { %1498 = vmatpush.msra.mxu0 %v1420_v52  ;;  %1720 = vmatpush.msrb.mxu3 %v1420_v52 }
 0x959   :  { %v1296_v62 = vpop.permute.xlu1 %1295  ;;  %v1444_v29 = vpop.permute.xlu0 %1443 }
 0x95a   :  { %v1300_v0 = vsel %vm76_vm7, %v2026_v36, %v1296_v62 }
 0x95b   :  { %1499 = vmatpush.msra.mxu0 %v1300_v0  ;;  %1721 = vmatpush.msrb.mxu3 %v1300_v0 }
 0x95c   :  { %1701 = vmatmul.msk.f32.vlgmr.msra.gmra.mxu0 %vm1040_vm13, %v1423_v56  ;;  %1703 = vmatmul.msk.f32.vlgmr.msrb.gmra.mxu3 %vm1040_vm13, %v1427_v55 }
 0x961   :  { %v1434_v35 = vpop.permute.xlu1 %1433 }
 0x964   :  { %1702 = vmatmul.msk.f32.gmra.mxu0 %vm1040_vm13, %v1425_v1 }
 0x9c8   :  { %v1475_v2 = vpop.f32.mrf.mxu2 }
 0x9c9   :  { %v1476_v21 = vadd.f32 %v1475_v2, %v1434_v35  ;;  %v1541_v2 = vld [vmem:[%s3296_s9 + $0x10] sm:$0xf]  ;;  %v1540_v35 = vld [vmem:[%s3296_s9 + $0x8] sm:$0xff] }
 0x9d0   :  { %v1478_v41 = vpop.f32.mrf.mxu2 }
 0x9d1   :  { %v1479_v8 = vadd.f32 %v1478_v41, %v1439_v4 }
 0x9d8   :  { %v1481_v61 = vpop.f32.mrf.mxu2 }
 0x9d9   :  { %v1501_v54 = vpop.f32.mrf.mxu0  ;;  %v1482_v32 = vadd.f32 %v1481_v61, %v1444_v29 }
 0x9da   :  { %v1502_v3 = vadd.f32 %v1501_v54, %v1476_v21 }
 0x9dc   :  { %v1510_v63 = vmax.f32 %v1502_v3, 0.0 }
 0x9de   :  { %1513 = vadd.xlane.f32.xlu1 %v1510_v63 }
 0x9df   :  { %v1507_v5 = vpop.f32.mrf.mxu3 }
 0x9e0   :  { %v1508_v9 = vadd.f32 %v1507_v5, %v1482_v32 }
 0x9e1   :  { %v1504_v10 = vpop.f32.mrf.mxu0 }
 0x9e2   :  { %v1512_v11 = vmax.f32 %v1508_v9, 0.0  ;;  %v1505_v50 = vadd.f32 %v1504_v10, %v1479_v8 }
 0x9e4   :  { %v1511_v53 = vmax.f32 %v1505_v50, 0.0  ;;  %v1517_v57 = vsel %vm183_vm4, %v1512_v11, 0.0 }
 0x9e5   :  { %1518 = vadd.xlane.f32.xlu0 %v1517_v57 }
 0x9e6   :  { %1515 = vadd.xlane.f32.xlu2 %v1511_v53 }
 0xa51   :  { %v1514_v13 = vpop.xlane.xlu1 %1513 }
 0xa52   :  { %v1520_v51 = vmul.f32 %v1514_v13, %v2290_v16 }
 0xa54   :  { %v3086_v58 = vsub.f32 %v1510_v63, %v1520_v51  ;;  %v1596_v63 = vld [vmem:[%s3295_s8] sm:$0xff] }
 0xa56   :  { %v1526_v14 = vmul.f32 %v3086_v58, %v3086_v58 }
 0xa58   :  { %v1519_v27 = vpop.xlane.xlu0 %1518  ;;  %1529 = vadd.xlane.f32.xlu1 %v1526_v14 }
 0xa59   :  { %v1522_v31 = vmul.f32 %v1519_v27, %v2290_v16  ;;  %v1516_v46 = vpop.xlane.xlu2 %1515 }
 0xa5a   :  { %v1521_v47 = vmul.f32 %v1516_v46, %v2290_v16 }
 0xa5b   :  { %v3092_v12 = vsub.f32 %v1512_v11, %v1522_v31 }
 0xa5c   :  { %v3094_v49 = vsub.f32 %v1511_v53, %v1521_v47  ;;  %v1648_v47 = vld [vmem:[%s3297_s14] sm:$0xf] }
 0xa5d   :  { %v1528_v43 = vmul.f32 %v3092_v12, %v3092_v12 }
 0xa5e   :  { %v1527_v15 = vmul.f32 %v3094_v49, %v3094_v49 }
 0xa5f   :  { %v1533_v17 = vsel %vm183_vm4, %v1528_v43, 0.0 }
 0xa60   :  { %1534 = vadd.xlane.f32.xlu0 %v1533_v17  ;;  %1531 = vadd.xlane.f32.xlu2 %v1527_v15 }
 0xa78   :  { %1611 = vperm.xlu2 %1744, %v1598_v6  }
 0xa80   :  { %1606 = vperm.xlu2 %1744, %v1597_v39  }
 0xacb   :  { %v1530_v18 = vpop.xlane.xlu1 %1529 }
 0xacc   :  { %v1536_v44 = vmul.f32 %v1530_v18, %v2290_v16  ;;  %v1647_v18 = vld [vmem:[%s3298_s22] sm:$0xf] }
 0xace   :  { %v1542_v19 = vadd.f32 1e-05, %v1536_v44 }
 0xad0   :  { %2047 = vrsqrt.f32 %v1542_v19  ;;  %vm1551_vm2 = vweird.f32 %v1542_v19 }
 0xad3   :  { %v1535_v23 = vpop.xlane.xlu0 %1534  ;;  %v1532_v24 = vpop.xlane.xlu2 %1531 }
 0xad4   :  { %v1538_v25 = vmul.f32 %v1535_v23, %v2290_v16  ;;  %v1537_v26 = vmul.f32 %v1532_v24, %v2290_v16 }
 0xad6   :  { %v2048_v30 = vpop.eup %2047  ;;  %v1544_v33 = vadd.f32 1e-05, %v1538_v25  ;;  %v1543_v59 = vadd.f32 1e-05, %v1537_v26 }
 0xad7   :  { %v1546_v37 = vmul.f32 %v2048_v30, %v1542_v19  ;;  %vm1552_vm0 = vweird.f32 %v2048_v30  ;;  %v1682_v19 = vld [vmem:[%s3299_s27] sm:$0x3] }
 0xad8   :  { %2049 = vrsqrt.f32 %v1544_v33  ;;  %vm1553_vm8 = vmor %vm1551_vm2, %vm1552_vm0  ;;  %vm1571_vm5 = vweird.f32 %v1544_v33  ;;  %vm1561_vm11 = vweird.f32 %v1543_v59  ;;  %1683 = vst [vmem:[%s3300_s25 + $0x4] sm:$0x3] %v1682_v19 }
 0xad9   :  { %v1547_v42 = vmul.f32 %v2048_v30, %v1546_v37  ;;  %2051 = vrsqrt.f32 %v1543_v59 }
 0xadb   :  { %v1548_v45 = vmul.f32 0.5, %v1547_v42  ;;  %v1612_v32 = vpop.permute.xlu2 %1611 }
 0xadd   :  { %v1549_v20 = vsub.f32 1.5, %v1548_v45 }
 0xade   :  { %v2050_v34 = vpop.eup %2049 }
 0xadf   :  { %v2052_v38 = vpop.eup %2051  ;;  %v1550_v28 = vmul.f32 %v2048_v30, %v1549_v20  ;;  %v1566_v40 = vmul.f32 %v2050_v34, %v1544_v33  ;;  %vm1572_vm13 = vweird.f32 %v2050_v34 }
 0xae0   :  { %v1556_v16 = vmul.f32 %v2052_v38, %v1543_v59  ;;  %vm1562_vm12 = vweird.f32 %v2052_v38  ;;  %vm1573_vm10 = vmor %vm1571_vm5, %vm1572_vm13 }
 0xae1   :  { %v1567_v22 = vmul.f32 %v2050_v34, %v1566_v40  ;;  %v1554_v60 = vsel %vm1553_vm8, %v2048_v30, %v1550_v28  ;;  %vm1563_vm3 = vmor %vm1561_vm11, %vm1562_vm12 }
 0xae2   :  { %v1557_v52 = vmul.f32 %v2052_v38, %v1556_v16  ;;  %v1575_v36 = vmul.f32 %v1554_v60, %v1539_v48 }
 0xae3   :  { %v1568_v62 = vmul.f32 0.5, %v1567_v22  ;;  %v1607_v10 = vpop.permute.xlu2 %1606 }
 0xae4   :  { %v1558_v56 = vmul.f32 0.5, %v1557_v52  ;;  %1580 = vperm.xlu0 %1745, %v1575_v36  }
 0xae5   :  { %v1569_v55 = vsub.f32 1.5, %v1568_v62 }
 0xae6   :  { %v1559_v0 = vsub.f32 1.5, %v1558_v56 }
 0xae7   :  { %v1570_v1 = vmul.f32 %v2050_v34, %v1569_v55 }
 0xae8   :  { %v1560_v41 = vmul.f32 %v2052_v38, %v1559_v0 }
 0xae9   :  { %v1574_v21 = vsel %vm1573_vm10, %v2050_v34, %v1570_v1 }
 0xaea   :  { %v1564_v54 = vsel %vm1563_vm3, %v2052_v38, %v1560_v41  ;;  %v1577_v3 = vmul.f32 %v1574_v21, %v1541_v2 }
 0xaeb   :  { %v1576_v61 = vmul.f32 %v1564_v54, %v1540_v35 }
 0xaec   :  { %1590 = vperm.xlu0 %1745, %v1577_v3  }
 0xaed   :  { %1585 = vperm.xlu1 %1746, %v1576_v61  }
 0xaf4   :  { %1601 = vperm.xlu0 %1745, %v1596_v63  }
 0xb56   :  { %v1581_v29 = vpop.permute.xlu0 %1580 }
 0xb57   :  { %v1593_v13 = vmul.f32 %v1581_v29, %v3086_v58 }
 0xb5e   :  { %v1591_v4 = vpop.permute.xlu0 %1590 }
 0xb5f   :  { %v1595_v5 = vmul.f32 %v1591_v4, %v3092_v12  ;;  %v1586_v8 = vpop.permute.xlu1 %1585 }
 0xb60   :  { %v1594_v9 = vmul.f32 %v1586_v8, %v3094_v49 }
 0xb61   :  { %v1616_v11 = vadd.f32 %v1612_v32, %v1595_v5 }
 0xb62   :  { %v1615_v50 = vadd.f32 %v1607_v10, %v1594_v9 }
 0xb63   :  { %1630 = vrot.lane.b32.xlu1 %v1616_v11, %s3273_s20  ;;  %v1641_v53 = vrot.slane %v1616_v11, 4 }
 0xb64   :  { %1628 = vrot.lane.b32.xlu2 %v1615_v50, %s3273_s20  ;;  %v1639_v57 = vrot.slane %v1615_v50, 4 }
 0xb66   :  { %v1602_v51 = vpop.permute.xlu0 %1601  ;;  %v1642_v14 = vsel %vm183_vm4, %v1639_v57, %v1641_v53 }
 0xb67   :  { %v1614_v27 = vadd.f32 %v1602_v51, %v1593_v13 }
 0xb69   :  { %1626 = vrot.lane.b32.xlu0 %v1614_v27, %s3273_s20  ;;  %v1638_v31 = vrot.slane %v1614_v27, 4 }
 0xb6b   :  { %1621 = vrot.lane.b32.xlu1 %v1616_v11, %s3248_s26  ;;  %v1640_v46 = vsel %vm183_vm4, %v1638_v31, %v1639_v57 }
 0xb6c   :  { %1619 = vrot.lane.b32.xlu2 %v1615_v50, %s3248_s26 }
 0xb71   :  { %1617 = vrot.lane.b32.xlu0 %v1614_v27, %s3248_s26 }
 0xb73   :  { %1651 = vperm.xlu1 %1746, %v1648_v47  }
 0xbbe   :  { %v1629_v49 = vpop.permute.xlu2 %1628 }
 0xbc6   :  { %v1620_v39 = vpop.permute.xlu2 %1619 }
 0xbd5   :  { %v1631_v58 = vpop.permute.xlu1 %1630 }
 0xbd6   :  { %v1634_v12 = vsel %vm76_vm7, %v1631_v58, 0.0 }
 0xbd7   :  { %1704 = vmatpush.msk.msrb.mxu1 %vm183_vm4, %v1634_v12 }
 0xbd9   :  { %1705 = vmatpush.msk.msrb.mxu1 %vm76_vm7, %v1629_v49 }
 0xbdb   :  { %v1627_v43 = vpop.permute.xlu0 %1626 }
 0xbdc   :  { %1706 = vmatpush.msk.msrb.mxu1 %vm76_vm7, %v1627_v43 }
 0xbdd   :  { %v1622_v15 = vpop.permute.xlu1 %1621 }
 0xbde   :  { %v1625_v17 = vsel %vm81_vm6, %v1622_v15, 0.0  ;;  %1672 = vmatpush.msrb.mxu1 %v1642_v14 }
 0xbdf   :  { %v1646_v6 = vsel %vm183_vm4, %v1625_v17, %v1638_v31 }
 0xbe0   :  { %1673 = vmatpush.msrb.mxu1 %v1640_v46 }
 0xbe2   :  { %1674 = vmatpush.msrb.mxu1 %v1646_v6 }
 0xbe3   :  { %v1618_v44 = vpop.permute.xlu0 %1617 }
 0xbe4   :  { %1707 = vmatpush.msk.msrb.mxu1 %vm81_vm6, %v1620_v39 }
 0xbe5   :  { %v1652_v23 = vpop.permute.xlu1 %1651 }
 0xbe6   :  { %1708 = vmatpush.msk.msrb.mxu1 %vm81_vm6, %v1618_v44 }
 0xbe7   :  { %1709 = vmatmul.msk.f32.vlgmr.msrb.gmra.mxu1 %vm1654_vm15, %v1647_v18 }
 0xc64   :  { %v1678_v24 = vpop.f32.mrf.mxu1 }
 0xc65   :  { %v1679_v25 = vadd.f32 %v1678_v24, %v1652_v23 }
 0xc67   :  { %1681 = vst [vmem:[%s3300_s25] sm:$0xf] %v1679_v25 }

</bundles_post_ra>
